<compile_context>
chip_gen: v7x
topology: tpu7x:2x2x1
jax: 0.10.0
libtpu: 0.0.40
codegen_flags: <defaults>
</compile_context>

<pallas_src>
import jax
import jax.numpy as jnp
from jax.experimental import pallas as pl
from jax.experimental.pallas import tpu as pltpu


def make_mlp_block_kernel(eps: float):
    def kernel(x_ref, scale_ref, w1_ref, b1_ref, w2_ref, b2_ref, o_ref):
        bt, dim1, dim2 = x_ref.shape
        d_out = o_ref.shape[2]

        # ---- RMSNorm over the last two dims, per batch element (f32 on the VPU) ----
        x = x_ref[...].astype(jnp.float32)                       # [Bt, dim1, dim2]
        ssq = jnp.sum(x * x, axis=2, keepdims=True)               # lane reduce    -> [Bt, dim1, 1]
        ssq = jnp.sum(ssq, axis=1, keepdims=True)                 # sublane reduce -> [Bt, 1, 1]
        inv_rms = jax.lax.rsqrt(ssq * (1.0 / float(dim1 * dim2)) + eps)

        scale = scale_ref[...].astype(jnp.float32)                # [dim1, dim2] (loaded once)
        xn = (x * inv_rms) * scale[None, :, :]                    # [Bt, dim1, dim2]

        # ---- fold batches into the matmul M dimension: [Bt*dim1, dim2] ----
        xn2 = xn.reshape(bt * dim1, dim2).astype(jnp.bfloat16)

        # Linear(dim2 -> d_model) + bias + ReLU  (bf16 inputs, f32 accumulation)
        h = jnp.dot(xn2, w1_ref[...], preferred_element_type=jnp.float32)
        h = jnp.maximum(h + b1_ref[...], 0.0)                     # b1 is [1, d_model] f32

        # TODO(synk): training-mode Dropout(p=0.1) not implemented; eval-mode identity used.

        # Linear(d_model -> d_out)
        o = jnp.dot(h.astype(jnp.bfloat16), w2_ref[...],
                    preferred_element_type=jnp.float32)
        o = o + b2_ref[...]                                       # [Bt*dim1, d_out]

        o_ref[...] = o.reshape(bt, dim1, d_out).astype(o_ref.dtype)

    return kernel


def _pick_batch_fold(B, dim1, target_rows=1024):
    """Fold batches so each grid step does ~target_rows matmul rows.

    Prefers Bt*dim1 % 8 == 0 (so the in-kernel (Bt,dim1,dim2)->(Bt*dim1,dim2) reshape is
    pure re-indexing) and splits a single-step schedule into two steps so both v7x
    TensorCores get work (extra ~600-cycle step is negligible on single-TC v5e/v6e)."""
    bt = max(1, min(B, target_rows // max(dim1, 1)))
    if bt >= B and B > 1:
        bt = -(-B // 2)                      # two big steps instead of one
    while bt > 1 and (bt * dim1) % 8 != 0:
        bt -= 1
    return bt


def prepare_mlp_params(scale, w1, b1, w2, b2, weight_dtype=jnp.bfloat16):
    """One-time parameter prep (hoisted out of the per-call path): bf16 weights,
    f32 row-vector biases, f32 RMSNorm scale."""
    return (scale.astype(jnp.float32),
            w1.astype(weight_dtype),
            b1.reshape(1, -1).astype(jnp.float32),
            w2.astype(weight_dtype),
            b2.reshape(1, -1).astype(jnp.float32))


def mlp_block_pallas(x, params, eps=1e-8, block_b=None, out_dtype=None):
    """x: [B, dim1, dim2] (any float dtype, unpadded); params from prepare_mlp_params.
       Returns [B, dim1, d_out] in out_dtype (default: x.dtype)."""
    scale, w1, b1, w2, b2 = params
    B, dim1, dim2 = x.shape
    d_model = w1.shape[1]
    d_out = w2.shape[1]
    if out_dtype is None:
        out_dtype = x.dtype

    Bt = block_b if block_b is not None else _pick_batch_fold(B, dim1)
    grid = (pl.cdiv(B, Bt),)   # uneven tails are handled by Pallas (per-row independent math)

    def build(single_buffer_residents):
        def resident(shape):
            idx = lambda b: (0,) * len(shape)
            if single_buffer_residents and hasattr(pl, "Buffered"):
                # Constant block index -> no re-DMA needed; single buffer frees VMEM headroom.
                return pl.BlockSpec(shape, idx, pipeline_mode=pl.Buffered(1))
            return pl.BlockSpec(shape, idx)

        grid_spec = pltpu.PrefetchScalarGridSpec(
            num_scalar_prefetch=0,
            grid=grid,
            in_specs=[
                pl.BlockSpec((Bt, dim1, dim2), lambda b: (b, 0, 0)),   # x: native dtype, unpadded
                resident((dim1, dim2)),                                # RMSNorm scale (f32)
                resident((dim2, d_model)),                             # W1 (bf16, resident)
                resident((1, d_model)),                                # b1 (f32)
                resident((d_model, d_out)),                            # W2 (bf16, resident)
                resident((1, d_out)),                                  # b2 (f32)
            ],
            out_specs=pl.BlockSpec((Bt, dim1, d_out), lambda b: (b, 0, 0)),
        )
        return pl.pallas_call(
            make_mlp_block_kernel(eps),
            out_shape=jax.ShapeDtypeStruct((B, dim1, d_out), out_dtype),
            grid_spec=grid_spec,
            compiler_params=pltpu.CompilerParams(
                dimension_semantics=("parallel",),
                vmem_limit_bytes=48 * 1024 * 1024,
            ),
        )

    try:
        return build(True)(x, scale, w1, b1, w2, b2)
    except Exception:
        # Fallback if single-buffered resident blocks are unsupported in this jax version:
        # identical semantics, just default double-buffered weights.
        return build(False)(x, scale, w1, b1, w2, b2)


def mlp_block_ref(x, scale, w1, b1, w2, b2, eps=1e-8):
    """Pure-JAX reference matching the PyTorch forward (eval mode)."""
    rms = jnp.sqrt(jnp.mean(x ** 2, axis=(-2, -1), keepdims=True) + eps)
    xn = scale * x / rms
    h = jnp.maximum(xn @ w1 + b1.reshape(1, -1), 0.0)
    return h @ w2 + b2.reshape(1, -1)


if __name__ == "__main__":
    # Small shapes consistent with MLP_block(dim1, dim2, d_model, d_out).
    # dim2 / d_out intentionally non-multiples of 128 to exercise the unpadded / masked-store path.
    B, dim1, dim2, d_model, d_out = 32, 8, 96, 256, 192
    eps = 1e-8

    key = jax.random.PRNGKey(0)
    kx, k1, k2, k3, k4 = jax.random.split(key, 5)

    x = jax.random.normal(kx, (B, dim1, dim2), dtype=jnp.float32)

    # Deterministic parameter init (PyTorch-Linear-style uniform bounds)
    scale = jnp.ones((dim1, dim2), dtype=jnp.float32)            # RMSNorm scale init = ones
    bound1 = 1.0 / (dim2 ** 0.5)
    w1 = jax.random.uniform(k1, (dim2, d_model), jnp.float32, -bound1, bound1)
    b1 = jax.random.uniform(k2, (d_model,), jnp.float32, -bound1, bound1)
    bound2 = 1.0 / (d_model ** 0.5)
    w2 = jax.random.uniform(k3, (d_model, d_out), jnp.float32, -bound2, bound2)
    b2 = jax.random.uniform(k4, (d_out,), jnp.float32, -bound2, bound2)

    # One-time parameter prep (hoisted out of the per-call path).
    params = prepare_mlp_params(scale, w1, b1, w2, b2)

    out = mlp_block_pallas(x, params, eps=eps)
    out = jax.block_until_ready(out)

    ref = mlp_block_ref(x, scale, w1, b1, w2, b2, eps=eps)
    assert out.shape == (B, dim1, d_out)
    # bf16 matmul inputs (f32 accumulation) -> slightly looser tolerance than pure-f32.
    assert jnp.allclose(out, ref, atol=5e-2, rtol=5e-2), "mismatch vs JAX reference"

    print("KERNEL_OK")
</pallas_src>

<mosaic_0001>
module attributes {stable_mosaic.version = 11 : i64} {
  func.func @kernel(%arg0: i32, %arg1: memref<16x8x96xf32, #tpu.memory_space<vmem>>, %arg2: memref<8x96xf32, #tpu.memory_space<vmem>>, %arg3: memref<96x256xbf16, #tpu.memory_space<vmem>>, %arg4: memref<1x256xf32, #tpu.memory_space<vmem>>, %arg5: memref<256x192xbf16, #tpu.memory_space<vmem>>, %arg6: memref<1x192xf32, #tpu.memory_space<vmem>>, %arg7: memref<16x8x192xf32, #tpu.memory_space<vmem>>) attributes {dimension_semantics = [#tpu.dimension_semantics<parallel>], iteration_bounds = array<i64: 2>, scalar_prefetch = 0 : i64, scratch_operands = 0 : i64, tpu.core_type = #tpu.core_type<tc>, window_params = [{transform_indices = @transform_0, window_bounds = array<i64: 16, 8, 96>}, {pipeline_mode = #tpu.pipeline_mode<synchronous>, transform_indices = @transform_1, window_bounds = array<i64: 8, 96>}, {pipeline_mode = #tpu.pipeline_mode<synchronous>, transform_indices = @transform_2, window_bounds = array<i64: 96, 256>}, {pipeline_mode = #tpu.pipeline_mode<synchronous>, transform_indices = @transform_3, window_bounds = array<i64: 1, 256>}, {pipeline_mode = #tpu.pipeline_mode<synchronous>, transform_indices = @transform_4, window_bounds = array<i64: 256, 192>}, {pipeline_mode = #tpu.pipeline_mode<synchronous>, transform_indices = @transform_5, window_bounds = array<i64: 1, 192>}, {transform_indices = @transform_6, window_bounds = array<i64: 16, 8, 192>}]} {
    %c0 = arith.constant 0 : index
    %c0_0 = arith.constant 0 : index
    %c0_1 = arith.constant 0 : index
    %0 = vector.load %arg1[%c0, %c0_0, %c0_1] : memref<16x8x96xf32, #tpu.memory_space<vmem>>, vector<16x8x96xf32>
    %1 = arith.mulf %0, %0 : vector<16x8x96xf32>
    %cst = arith.constant dense<0.000000e+00> : vector<16x8xf32>
    %2 = vector.multi_reduction <add>, %1, %cst [2] : vector<16x8x96xf32> to vector<16x8xf32>
    %3 = vector.shape_cast %2 : vector<16x8xf32> to vector<16x8x1xf32>
    %cst_2 = arith.constant dense<0.000000e+00> : vector<16x1xf32>
    %4 = vector.multi_reduction <add>, %3, %cst_2 [1] : vector<16x8x1xf32> to vector<16x1xf32>
    %5 = vector.shape_cast %4 : vector<16x1xf32> to vector<16x1x1xf32>
    %cst_3 = arith.constant 0.00130208337 : f32
    %6 = vector.broadcast %cst_3 : f32 to vector<16x1x1xf32>
    %7 = arith.mulf %5, %6 : vector<16x1x1xf32>
    %cst_4 = arith.constant 9.99999993E-9 : f32
    %8 = vector.broadcast %cst_4 : f32 to vector<16x1x1xf32>
    %9 = arith.addf %7, %8 : vector<16x1x1xf32>
    %10 = math.rsqrt %9 : vector<16x1x1xf32>
    %c0_5 = arith.constant 0 : index
    %c0_6 = arith.constant 0 : index
    %11 = vector.load %arg2[%c0_5, %c0_6] : memref<8x96xf32, #tpu.memory_space<vmem>>, vector<8x96xf32>
    %12 = vector.broadcast %10 : vector<16x1x1xf32> to vector<16x8x96xf32>
    %13 = arith.mulf %0, %12 : vector<16x8x96xf32>
    %14 = vector.shape_cast %11 : vector<8x96xf32> to vector<1x8x96xf32>
    %15 = vector.broadcast %14 : vector<1x8x96xf32> to vector<16x8x96xf32>
    %16 = arith.mulf %13, %15 : vector<16x8x96xf32>
    %17 = vector.shape_cast %16 : vector<16x8x96xf32> to vector<128x96xf32>
    %18 = arith.truncf %17 : vector<128x96xf32> to vector<128x96xbf16>
    %c0_7 = arith.constant 0 : index
    %c0_8 = arith.constant 0 : index
    %19 = vector.load %arg3[%c0_7, %c0_8] : memref<96x256xbf16, #tpu.memory_space<vmem>>, vector<96x256xbf16>
    %cst_9 = arith.constant dense<0.000000e+00> : vector<128x256xf32>
    %20 = tpu.matmul %18, %19, %cst_9 {dimension_numbers = #tpu.dot_dimension_numbers<[1], [0], [0], [1], [0, 0, 1, 1], [], []>} : vector<128x96xbf16>, vector<96x256xbf16>, vector<128x256xf32> -> vector<128x256xf32>
    %c0_10 = arith.constant 0 : index
    %c0_11 = arith.constant 0 : index
    %21 = vector.load %arg4[%c0_10, %c0_11] : memref<1x256xf32, #tpu.memory_space<vmem>>, vector<1x256xf32>
    %22 = vector.broadcast %21 : vector<1x256xf32> to vector<128x256xf32>
    %23 = arith.addf %20, %22 : vector<128x256xf32>
    %cst_12 = arith.constant 0.000000e+00 : f32
    %24 = vector.broadcast %cst_12 : f32 to vector<128x256xf32>
    %25 = arith.maximumf %23, %24 : vector<128x256xf32>
    %26 = arith.truncf %25 : vector<128x256xf32> to vector<128x256xbf16>
    %c0_13 = arith.constant 0 : index
    %c0_14 = arith.constant 0 : index
    %27 = vector.load %arg5[%c0_13, %c0_14] : memref<256x192xbf16, #tpu.memory_space<vmem>>, vector<256x192xbf16>
    %cst_15 = arith.constant dense<0.000000e+00> : vector<128x192xf32>
    %28 = tpu.matmul %26, %27, %cst_15 {dimension_numbers = #tpu.dot_dimension_numbers<[1], [0], [0], [1], [0, 0, 1, 1], [], []>} : vector<128x256xbf16>, vector<256x192xbf16>, vector<128x192xf32> -> vector<128x192xf32>
    %c0_16 = arith.constant 0 : index
    %c0_17 = arith.constant 0 : index
    %29 = vector.load %arg6[%c0_16, %c0_17] : memref<1x192xf32, #tpu.memory_space<vmem>>, vector<1x192xf32>
    %30 = vector.broadcast %29 : vector<1x192xf32> to vector<128x192xf32>
    %31 = arith.addf %28, %30 : vector<128x192xf32>
    %32 = vector.shape_cast %31 : vector<128x192xf32> to vector<16x8x192xf32>
    %c0_18 = arith.constant 0 : index
    %c0_19 = arith.constant 0 : index
    %c0_20 = arith.constant 0 : index
    %33 = vector.load %arg7[%c0_18, %c0_19, %c0_20] : memref<16x8x192xf32, #tpu.memory_space<vmem>>, vector<16x8x192xf32>
    tpu.vector_store %arg7[%c0_18, %c0_19, %c0_20], %32 {strides = array<i32>} : memref<16x8x192xf32, #tpu.memory_space<vmem>>, vector<16x8x192xf32>,
    return
  }
  func.func @transform_0(%arg0: i32) -> (i32, i32, i32) {
    %c0_i32 = arith.constant 0 : i32
    %c0_i32_0 = arith.constant 0 : i32
    %c0_i32_1 = arith.constant 0 : i32
    return %arg0, %c0_i32, %c0_i32_0 : i32, i32, i32
  }
  func.func @transform_1(%arg0: i32) -> (i32, i32) {
    %c0_i32 = arith.constant 0 : i32
    %c0_i32_0 = arith.constant 0 : i32
    %c0_i32_1 = arith.constant 0 : i32
    return %c0_i32, %c0_i32_0 : i32, i32
  }
  func.func @transform_2(%arg0: i32) -> (i32, i32) {
    %c0_i32 = arith.constant 0 : i32
    %c0_i32_0 = arith.constant 0 : i32
    %c0_i32_1 = arith.constant 0 : i32
    return %c0_i32, %c0_i32_0 : i32, i32
  }
  func.func @transform_3(%arg0: i32) -> (i32, i32) {
    %c0_i32 = arith.constant 0 : i32
    %c0_i32_0 = arith.constant 0 : i32
    %c0_i32_1 = arith.constant 0 : i32
    return %c0_i32, %c0_i32_0 : i32, i32
  }
  func.func @transform_4(%arg0: i32) -> (i32, i32) {
    %c0_i32 = arith.constant 0 : i32
    %c0_i32_0 = arith.constant 0 : i32
    %c0_i32_1 = arith.constant 0 : i32
    return %c0_i32, %c0_i32_0 : i32, i32
  }
  func.func @transform_5(%arg0: i32) -> (i32, i32) {
    %c0_i32 = arith.constant 0 : i32
    %c0_i32_0 = arith.constant 0 : i32
    %c0_i32_1 = arith.constant 0 : i32
    return %c0_i32, %c0_i32_0 : i32, i32
  }
  func.func @transform_6(%arg0: i32) -> (i32, i32, i32) {
    %c0_i32 = arith.constant 0 : i32
    %c0_i32_0 = arith.constant 0 : i32
    %c0_i32_1 = arith.constant 0 : i32
    return %arg0, %c0_i32, %c0_i32_0 : i32, i32, i32
  }
}

module attributes {stable_mosaic.version = 11 : i64} {
  func.func @kernel(%arg0: i32, %arg1: memref<16x8x96xf32, #tpu.memory_space<vmem>>, %arg2: memref<8x96xf32, #tpu.memory_space<vmem>>, %arg3: memref<96x256xbf16, #tpu.memory_space<vmem>>, %arg4: memref<1x256xf32, #tpu.memory_space<vmem>>, %arg5: memref<256x192xbf16, #tpu.memory_space<vmem>>, %arg6: memref<1x192xf32, #tpu.memory_space<vmem>>, %arg7: memref<16x8x192xf32, #tpu.memory_space<vmem>>) attributes {dimension_semantics = [#tpu.dimension_semantics<parallel>], iteration_bounds = array<i64: 2>, scalar_prefetch = 0 : i64, scratch_operands = 0 : i64, tpu.core_type = #tpu.core_type<tc>, window_params = [{transform_indices = @transform_0, window_bounds = array<i64: 16, 8, 96>}, {pipeline_mode = #tpu.pipeline_mode<synchronous>, transform_indices = @transform_1, window_bounds = array<i64: 8, 96>}, {pipeline_mode = #tpu.pipeline_mode<synchronous>, transform_indices = @transform_2, window_bounds = array<i64: 96, 256>}, {pipeline_mode = #tpu.pipeline_mode<synchronous>, transform_indices = @transform_3, window_bounds = array<i64: 1, 256>}, {pipeline_mode = #tpu.pipeline_mode<synchronous>, transform_indices = @transform_4, window_bounds = array<i64: 256, 192>}, {pipeline_mode = #tpu.pipeline_mode<synchronous>, transform_indices = @transform_5, window_bounds = array<i64: 1, 192>}, {transform_indices = @transform_6, window_bounds = array<i64: 16, 8, 192>}]} {
    %c0 = arith.constant 0 : index
    %c0_0 = arith.constant 0 : index
    %c0_1 = arith.constant 0 : index
    %0 = vector.load %arg1[%c0, %c0_0, %c0_1] : memref<16x8x96xf32, #tpu.memory_space<vmem>>, vector<16x8x96xf32>
    %1 = arith.mulf %0, %0 : vector<16x8x96xf32>
    %cst = arith.constant dense<0.000000e+00> : vector<16x8xf32>
    %2 = vector.multi_reduction <add>, %1, %cst [2] : vector<16x8x96xf32> to vector<16x8xf32>
    %3 = vector.shape_cast %2 : vector<16x8xf32> to vector<16x8x1xf32>
    %cst_2 = arith.constant dense<0.000000e+00> : vector<16x1xf32>
    %4 = vector.multi_reduction <add>, %3, %cst_2 [1] : vector<16x8x1xf32> to vector<16x1xf32>
    %5 = vector.shape_cast %4 : vector<16x1xf32> to vector<16x1x1xf32>
    %cst_3 = arith.constant 0.00130208337 : f32
    %6 = vector.broadcast %cst_3 : f32 to vector<16x1x1xf32>
    %7 = arith.mulf %5, %6 : vector<16x1x1xf32>
    %cst_4 = arith.constant 9.99999993E-9 : f32
    %8 = vector.broadcast %cst_4 : f32 to vector<16x1x1xf32>
    %9 = arith.addf %7, %8 : vector<16x1x1xf32>
    %10 = math.rsqrt %9 : vector<16x1x1xf32>
    %c0_5 = arith.constant 0 : index
    %c0_6 = arith.constant 0 : index
    %11 = vector.load %arg2[%c0_5, %c0_6] : memref<8x96xf32, #tpu.memory_space<vmem>>, vector<8x96xf32>
    %12 = vector.broadcast %10 : vector<16x1x1xf32> to vector<16x8x96xf32>
    %13 = arith.mulf %0, %12 : vector<16x8x96xf32>
    %14 = vector.shape_cast %11 : vector<8x96xf32> to vector<1x8x96xf32>
    %15 = vector.broadcast %14 : vector<1x8x96xf32> to vector<16x8x96xf32>
    %16 = arith.mulf %13, %15 : vector<16x8x96xf32>
    %17 = vector.shape_cast %16 : vector<16x8x96xf32> to vector<128x96xf32>
    %18 = arith.truncf %17 : vector<128x96xf32> to vector<128x96xbf16>
    %c0_7 = arith.constant 0 : index
    %c0_8 = arith.constant 0 : index
    %19 = vector.load %arg3[%c0_7, %c0_8] : memref<96x256xbf16, #tpu.memory_space<vmem>>, vector<96x256xbf16>
    %cst_9 = arith.constant dense<0.000000e+00> : vector<128x256xf32>
    %20 = tpu.matmul %18, %19, %cst_9 {dimension_numbers = #tpu.dot_dimension_numbers<[1], [0], [0], [1], [0, 0, 1, 1], [], []>} : vector<128x96xbf16>, vector<96x256xbf16>, vector<128x256xf32> -> vector<128x256xf32>
    %c0_10 = arith.constant 0 : index
    %c0_11 = arith.constant 0 : index
    %21 = vector.load %arg4[%c0_10, %c0_11] : memref<1x256xf32, #tpu.memory_space<vmem>>, vector<1x256xf32>
    %22 = vector.broadcast %21 : vector<1x256xf32> to vector<128x256xf32>
    %23 = arith.addf %20, %22 : vector<128x256xf32>
    %cst_12 = arith.constant 0.000000e+00 : f32
    %24 = vector.broadcast %cst_12 : f32 to vector<128x256xf32>
    %25 = arith.maximumf %23, %24 : vector<128x256xf32>
    %26 = arith.truncf %25 : vector<128x256xf32> to vector<128x256xbf16>
    %c0_13 = arith.constant 0 : index
    %c0_14 = arith.constant 0 : index
    %27 = vector.load %arg5[%c0_13, %c0_14] : memref<256x192xbf16, #tpu.memory_space<vmem>>, vector<256x192xbf16>
    %cst_15 = arith.constant dense<0.000000e+00> : vector<128x192xf32>
    %28 = tpu.matmul %26, %27, %cst_15 {dimension_numbers = #tpu.dot_dimension_numbers<[1], [0], [0], [1], [0, 0, 1, 1], [], []>} : vector<128x256xbf16>, vector<256x192xbf16>, vector<128x192xf32> -> vector<128x192xf32>
    %c0_16 = arith.constant 0 : index
    %c0_17 = arith.constant 0 : index
    %29 = vector.load %arg6[%c0_16, %c0_17] : memref<1x192xf32, #tpu.memory_space<vmem>>, vector<1x192xf32>
    %30 = vector.broadcast %29 : vector<1x192xf32> to vector<128x192xf32>
    %31 = arith.addf %28, %30 : vector<128x192xf32>
    %32 = vector.shape_cast %31 : vector<128x192xf32> to vector<16x8x192xf32>
    %c0_18 = arith.constant 0 : index
    %c0_19 = arith.constant 0 : index
    %c0_20 = arith.constant 0 : index
    %33 = vector.load %arg7[%c0_18, %c0_19, %c0_20] : memref<16x8x192xf32, #tpu.memory_space<vmem>>, vector<16x8x192xf32>
    tpu.vector_store %arg7[%c0_18, %c0_19, %c0_20], %32 {strides = array<i32>} : memref<16x8x192xf32, #tpu.memory_space<vmem>>, vector<16x8x192xf32>,
    return
  }
  func.func @transform_0(%arg0: i32) -> (i32, i32, i32) {
    %c0_i32 = arith.constant 0 : i32
    %c0_i32_0 = arith.constant 0 : i32
    %c0_i32_1 = arith.constant 0 : i32
    return %arg0, %c0_i32, %c0_i32_0 : i32, i32, i32
  }
  func.func @transform_1(%arg0: i32) -> (i32, i32) {
    %c0_i32 = arith.constant 0 : i32
    %c0_i32_0 = arith.constant 0 : i32
    %c0_i32_1 = arith.constant 0 : i32
    return %c0_i32, %c0_i32_0 : i32, i32
  }
  func.func @transform_2(%arg0: i32) -> (i32, i32) {
    %c0_i32 = arith.constant 0 : i32
    %c0_i32_0 = arith.constant 0 : i32
    %c0_i32_1 = arith.constant 0 : i32
    return %c0_i32, %c0_i32_0 : i32, i32
  }
  func.func @transform_3(%arg0: i32) -> (i32, i32) {
    %c0_i32 = arith.constant 0 : i32
    %c0_i32_0 = arith.constant 0 : i32
    %c0_i32_1 = arith.constant 0 : i32
    return %c0_i32, %c0_i32_0 : i32, i32
  }
  func.func @transform_4(%arg0: i32) -> (i32, i32) {
    %c0_i32 = arith.constant 0 : i32
    %c0_i32_0 = arith.constant 0 : i32
    %c0_i32_1 = arith.constant 0 : i32
    return %c0_i32, %c0_i32_0 : i32, i32
  }
  func.func @transform_5(%arg0: i32) -> (i32, i32) {
    %c0_i32 = arith.constant 0 : i32
    %c0_i32_0 = arith.constant 0 : i32
    %c0_i32_1 = arith.constant 0 : i32
    return %c0_i32, %c0_i32_0 : i32, i32
  }
  func.func @transform_6(%arg0: i32) -> (i32, i32, i32) {
    %c0_i32 = arith.constant 0 : i32
    %c0_i32_0 = arith.constant 0 : i32
    %c0_i32_1 = arith.constant 0 : i32
    return %arg0, %c0_i32, %c0_i32_0 : i32, i32, i32
  }
}

</mosaic_0001>

<bundles_post_ra>
// kernel: tpu_custom_call.1
= control target key start
LH: loop header
LB: loop body
LE: loop exit
PB: predicated region body
PF: predicated region fallthrough
CT: control target
= control target key end

     0   :  { %11 = vsyncpa [#allocation3], 0  ;;  %s2196_s0 = inlined_call_operand.vmem [shape: f32[32,8,96], index: 0, kind: input, shape index: {}]   ;;  %s2197_s1 = inlined_call_operand.vmem [shape: f32[8,96], index: 1, kind: input, shape index: {}]   ;;  %s2198_s2 = inlined_call_operand.vmem [shape: bf16[96,256], index: 2, kind: input, shape index: {}]   ;;  %s2199_s3 = inlined_call_operand.vmem [shape: f32[1,256], index: 3, kind: input, shape index: {}]   ;;  %s2200_s4 = inlined_call_operand.vmem [shape: bf16[256,192], index: 4, kind: input, shape index: {}]   ;;  %s2201_s5 = inlined_call_operand.vmem [shape: f32[1,192], index: 5, kind: input, shape index: {}]   ;;  %s2202_s6 = inlined_call_operand.hbm [shape: f32[32,8,192], index: 6, kind: output, shape index: {}]  }
   0x1   :  { %13 = vsyncpa [#allocation3 + $0x1], 0  ;;  %s1558_s21 = smov 0   ;;  %s1560_s22 = smov 0  }
   0x2   :  { %s1562_s23 = smov 0   ;;  %s1564_s24 = smov 0  }
   0x3 LB: > { %s1579_s25 = sadd.s32 4294967295, %s1517_s24   ;;  %s1216_s26 = sadd.s32 4294967294, %s1517_s24   ;;  %s1517_s24 = sphi %s1564_s24, %s2247_s24   ;;  %s1513_s23 = sphi %s1562_s23, %s2246_s23   ;;  %s1509_s22 = sphi %s1560_s22, %s2245_s22   ;;  %s1505_s21 = sphi %s1558_s21, %s2244_s21  }
   0x4   : > { %s1583_s27 = sadd.s32 1, %s1517_s24   ;;  %s157_s28 = sadd.s32 1, %s1513_s23 }
   0x5   : > { %s154_s29 = ssub.s32 %s1517_s24, %s1583_s27  ;;  %p167_p0 = scmp.ne.s32.totalorder %s1513_s23, %s1509_s22 }
   0x6   : > { %p155_p1 = scmp.eq.s32.totalorder %s154_s29, 0  ;;  %p168_p2 = scmp.eq.s32.totalorder %s1579_s25, 1 }
   0x7   : > { %p173_p3 = scmp.ne.s32.totalorder %s1509_s22, %s1505_s21  ;;  %p174_p4 = scmp.eq.s32.totalorder %s1216_s26, 1 }
   0x8   : > { %s1594_s30 = scalar_select %p155_p1, %s1513_s23, %s157_s28  }
   0x9   : > { %p1596_p5 = por %p168_p2, %p167_p0  ;;  %p1600_p6 = por %p174_p4, %p173_p3 }
   0xa   : > { %p1219_p7 = scmp.ge.s32.totalorder %s1517_s24, 1  ;;  %p216_p8 = scmp.lt.s32.totalorder %s1517_s24, 3 }
   0xc   : > { %p217_p9 = pnand %p1219_p7, %p216_p8 }
   0xe   : > { %220 = sbr.rel (%p217_p9) target bundleno = 720 (0x2d0), region = 44 }
  0x15   : > { %s1221_s9 = sshll.u32 %s1579_s25, 4  ;;  %vm286_vm0 = vcmask 785408   ;;  %v1357_v48 = vld [vmem:[%s2198_s2 + $0x4] ss:$8 sps:$4 sm:$0xff]   ;;  %v1359_v49 = vld [vmem:[%s2198_s2] ss:$8 sps:$4 sm:$0xff]  }
  0x16   : > { %p247_p10 = scmp.lt.s32.totalorder %s1221_s9, 31  ;;  %628 = vmatprep.subr.bf16.mxu0 %v1357_v48  ;;  %v1360_v50 = vld [vmem:[%s2198_s2 + $0x14] ss:$8 sps:$4 sm:$0xff]   ;;  %v1362_v51 = vld [vmem:[%s2198_s2 + $0x10] ss:$8 sps:$4 sm:$0xff]   ;;  %v2203_v60 = vmov 0  }
  0x17   : > { %629 = vmatpush1.bf16.msra.mxu0 %v1359_v49  ;;  %v1363_v52 = vld [vmem:[%s2198_s2 + $0x24] ss:$8 sps:$4 sm:$0xff]   ;;  %v1365_v53 = vld [vmem:[%s2198_s2 + $0x20] ss:$8 sps:$4 sm:$0xff]   ;;  %v1366_v54 = vld [vmem:[%s2198_s2 + $0x34] ss:$8 sps:$4 sm:$0xff]   ;;  %660 = vmatprep.mubr.bf16.mxu0 %v2203_v60 }
  0x18   : > { %s2249_s9 = smov (!%p247_p10, %s1221_s9), 31  ;;  %630 = vmatprep.subr.bf16.mxu0 %v1360_v50  ;;  %v1368_v55 = vld [vmem:[%s2198_s2 + $0x30] ss:$8 sps:$4 sm:$0xff]   ;;  %v1369_v56 = vld [vmem:[%s2198_s2 + $0x44] ss:$8 sps:$4 sm:$0xff]   ;;  %s243_s16 = sand.u32 1, %s1509_s22  }
  0x19   : > { %s1222_s10 = sshll.u32 %s2249_s9, 3  ;;  %v1371_v57 = vld [vmem:[%s2198_s2 + $0x40] ss:$8 sps:$4 sm:$0xff]   ;;  %v1372_v58 = vld [vmem:[%s2198_s2 + $0x54] ss:$8 sps:$4 sm:$0xff]   ;;  %s1220_s19 = sshll.u32 %s243_s16, 8 }
  0x1a   : > { %s1610_s13 = scalar_lea.vmem %s2196_s0, %s1222_s10  ;;  %v1374_v59 = vld [vmem:[%s2198_s2 + $0x50] ss:$8 sps:$4 sm:$0xff]   ;;  %v1377_v61 = vld [vmem:[%s2200_s4 + $0x4] ss:$8 sps:$4 sm:$0xff]   ;;  %v1751_v62 = vld [vmem:[%s2200_s4] ss:$8 sps:$4 sm:$0xff]  }
  0x1b   : > { %v1613_v0 = vld [vmem:[%s1610_s13 + $0x10] sm:$0xff]  ;;  %v1616_v1 = vld [vmem:[%s1610_s13] sm:$0xff]  ;;  %v1619_v2 = vld [vmem:[%s1610_s13 + $0x18] sm:$0xff]  ;;  %631 = vmatpush1.bf16.msra.mxu0 %v1362_v51  ;;  %1283 = vmatprep.subr.bf16.mxu1 %v1377_v61  ;;  %vm1107_vm1 = vcmask 523264   ;;  %s2064_s20 = scalar_lea.vmem [#allocation2], %s1220_s19  ;;  %s1282_s26 = sshll.u32 %s1579_s25, 12 }
  0x1c   : > { %v272_v3 = vmul.f32 %v1613_v0, %v1613_v0  ;;  %v270_v4 = vmul.f32 %v1616_v1, %v1616_v1  ;;  %v273_v5 = vmul.f32 %v1619_v2, %v1619_v2  ;;  %v1628_v6 = vld [vmem:[%s1610_s13 + $0x8] sm:$0xff]  ;;  %v1636_v9 = vld [vmem:[%s1610_s13 + $0x20] sm:$0xff]  ;;  %v1641_v12 = vld [vmem:[%s1610_s13 + $0x38] sm:$0xff]  ;;  %632 = vmatprep.subr.bf16.mxu0 %v1363_v52  ;;  %1299 = vmatpush1.bf16.msra.mxu1 %v1751_v62  ;;  %s1154_s28 = sshll.u32 %s2064_s20, 4  ;;  %s2143_s10 = scalar_lea.hbm %s2202_s6, %s1282_s26  ;;  %s2145_s28 = int_to_ptr.vmem [resolvable:$true] %s1154_s28 }
  0x1d   : > { %v271_v7 = vmul.f32 %v1628_v6, %v1628_v6  ;;  %v1633_v8 = vld [vmem:[%s1610_s13 + $0x28] sm:$0xff]  ;;  %v274_v16 = vmul.f32 %v1636_v9, %v1636_v9  ;;  %v1650_v17 = vld [vmem:[%s1610_s13 + $0x30] sm:$0xff]  ;;  %v1656_v19 = vld [vmem:[%s1610_s13 + $0x40] sm:$0xff]  ;;  %v277_v22 = vmul.f32 %v1641_v12, %v1641_v12  ;;  %s2155_s25 = scalar_lea.sflag [#allocation3], %s243_s16  ;;  %s1455_s11 = scalar_lea.vmem %s2145_s28, 4096 }
  0x1e   : > { %v293_v10 = vsel %vm286_vm0, %v272_v3, 0.0  ;;  %v287_v11 = vsel %vm286_vm0, %v270_v4, 0.0  ;;  %v296_v13 = vsel %vm286_vm0, %v273_v5, 0.0  ;;  %v275_v15 = vmul.f32 %v1633_v8, %v1633_v8  ;;  %v1653_v18 = vld [vmem:[%s1610_s13 + $0x48] sm:$0xff]  ;;  %v1671_v28 = vld [vmem:[%s1610_s13 + $0x58] sm:$0xff]  ;;  %v1674_v29 = vld [vmem:[%s1610_s13 + $0x50] sm:$0xff]  ;;  %p1456_p11 = scmp.ne.s32.totalorder %s2145_s28, %s1455_s11 }
  0x1f   : > { %294 = vadd.xlane.f32.xlu1 %v293_v10  ;;  %288 = vadd.xlane.f32.xlu0 %v287_v11  ;;  %v290_v14 = vsel %vm286_vm0, %v271_v7, 0.0  ;;  %v299_v21 = vsel %vm286_vm0, %v274_v16, 0.0  ;;  %v276_v23 = vmul.f32 %v1650_v17, %v1650_v17  ;;  %v308_v24 = vsel %vm286_vm0, %v277_v22, 0.0  ;;  %v1683_v34 = vld [vmem:[%s1610_s13 + $0x68] sm:$0xff]  ;;  %v1686_v35 = vld [vmem:[%s1610_s13 + $0x60] sm:$0xff]  ;;  %v1695_v40 = vld [vmem:[%s1610_s13 + $0x78] sm:$0xff] }
  0x20   : > { %v302_v20 = vsel %vm286_vm0, %v275_v15, 0.0  ;;  %v279_v26 = vmul.f32 %v1653_v18, %v1653_v18  ;;  %v278_v27 = vmul.f32 %v1656_v19, %v1656_v19  ;;  %v281_v32 = vmul.f32 %v1671_v28, %v1671_v28  ;;  %2219 = vst [vmem:[#allocation5_spill] sm:$0xff] %v1683_v34  ;;  %2220 = vst [vmem:[#allocation6_spill] sm:$0xff] %v1686_v35  ;;  %v1698_v41 = vld [vmem:[%s1610_s13 + $0x70] sm:$0xff]  ;;  %v1768_v4 = vld [vmem:[%s2200_s4 + $0x24] ss:$8 sps:$4 sm:$0xff]   ;;  %p1457_p12 = pnand %p1456_p11, %p1596_p5 }
  0x21   : > { %v305_v25 = vsel %vm286_vm0, %v276_v23, 0.0  ;;  %v280_v33 = vmul.f32 %v1674_v29, %v1674_v29  ;;  %v283_v38 = vmul.f32 %v1683_v34, %v1683_v34  ;;  %v282_v39 = vmul.f32 %v1686_v35, %v1686_v35  ;;  %2221 = vst [vmem:[#allocation7_spill] sm:$0xff] %v1695_v40  ;;  %2222 = vst [vmem:[#allocation8_spill] sm:$0xff] %v1698_v41  ;;  %v1756_v63 = vld [vmem:[%s2200_s4 + $0x14] ss:$8 sps:$4 sm:$0xff]   ;;  %s1520_s12 = smov [#allocation2]  }
  0x22   : > { %v314_v30 = vsel %vm286_vm0, %v279_v26, 0.0  ;;  %v311_v31 = vsel %vm286_vm0, %v278_v27, 0.0  ;;  %v320_v36 = vsel %vm286_vm0, %v281_v32, 0.0  ;;  %v285_v44 = vmul.f32 %v1695_v40, %v1695_v40  ;;  %633 = vmatpush1.bf16.msra.mxu0 %v1365_v53  ;;  %1284 = vmatprep.subr.bf16.mxu1 %v1756_v63  ;;  %v1763_v3 = vld [vmem:[%s2200_s4 + $0x10] ss:$8 sps:$4 sm:$0xff]   ;;  %p1458_p13 = pneg %p1457_p12  ;;  %s1459_s13 = sshll.u32 %s1520_s12, 4  ;;  %s1460_s13 = int_to_ptr.vmem [resolvable:$false] %s1459_s13 }
  0x23   : > { %297 = vadd.xlane.f32.xlu1 %v296_v13  ;;  %291 = vadd.xlane.f32.xlu0 %v290_v14  ;;  %v317_v37 = vsel %vm286_vm0, %v280_v33, 0.0  ;;  %v326_v42 = vsel %vm286_vm0, %v283_v38, 0.0  ;;  %v323_v43 = vsel %vm286_vm0, %v282_v39, 0.0  ;;  %v284_v45 = vmul.f32 %v1698_v41, %v1698_v41  ;;  %v1775_v5 = vld [vmem:[%s2200_s4 + $0x20] ss:$8 sps:$4 sm:$0xff]   ;;  %s1461_s14 = scalar_lea.vmem %s1460_s13, 8192  ;;  %p1462_p0 = scmp.lt.s32.totalorder %s2145_s28, %s1460_s13 }
  0x24   : > { %v332_v46 = vsel %vm286_vm0, %v285_v44, 0.0  ;;  %634 = vmatprep.subr.bf16.mxu0 %v1366_v54  ;;  %1300 = vmatpush1.bf16.msra.mxu1 %v1763_v3  ;;  %v1780_v7 = vld [vmem:[%s2200_s4 + $0x34] ss:$8 sps:$4 sm:$0xff]   ;;  %v1787_v10 = vld [vmem:[%s2200_s4 + $0x30] ss:$8 sps:$4 sm:$0xff]   ;;  %p1463_p1 = scmp.lt.s32.totalorder %s1461_s14, %s1455_s11 }
  0x25   : > { %v329_v47 = vsel %vm286_vm0, %v284_v45, 0.0  ;;  %1285 = vmatprep.subr.bf16.mxu1 %v1768_v4  ;;  %v1792_v11 = vld [vmem:[%s2200_s4 + $0x44] ss:$8 sps:$4 sm:$0xff]   ;;  %v1799_v13 = vld [vmem:[%s2200_s4 + $0x40] ss:$8 sps:$4 sm:$0xff]  }
  0x26   : > { %635 = vmatpush1.bf16.msra.mxu0 %v1368_v55  ;;  %v1804_v14 = vld [vmem:[%s2200_s4 + $0x54] ss:$8 sps:$4 sm:$0xff]   ;;  %v1811_v15 = vld [vmem:[%s2200_s4 + $0x50] ss:$8 sps:$4 sm:$0xff]   ;;  %v1816_v16 = vld [vmem:[%s2200_s4 + $0x64] ss:$8 sps:$4 sm:$0xff]   ;;  %p1464_p2 = por %p1463_p1, %p1462_p0 }
  0x27   : > { %303 = vadd.xlane.f32.xlu1 %v302_v20  ;;  %300 = vadd.xlane.f32.xlu0 %v299_v21  ;;  %v1823_v20 = vld [vmem:[%s2200_s4 + $0x60] ss:$8 sps:$4 sm:$0xff]   ;;  %v1828_v21 = vld [vmem:[%s2200_s4 + $0x74] ss:$8 sps:$4 sm:$0xff]   ;;  %v1835_v22 = vld [vmem:[%s2200_s4 + $0x70] ss:$8 sps:$4 sm:$0xff]  }
  0x28   : > { %636 = vmatprep.subr.bf16.mxu0 %v1369_v56  ;;  %1301 = vmatpush1.bf16.msra.mxu1 %v1775_v5  ;;  %v1840_v23 = vld [vmem:[%s2200_s4 + $0x84] ss:$8 sps:$4 sm:$0xff]   ;;  %v1847_v26 = vld [vmem:[%s2200_s4 + $0x80] ss:$8 sps:$4 sm:$0xff]   ;;  %v1859_v38 = vld [vmem:[%s2200_s4 + $0x90] ss:$8 sps:$4 sm:$0xff]   ;;  %p1465_p3 = pnand %p1464_p2, %p1458_p13 }
  0x29   : > { %1286 = vmatprep.subr.bf16.mxu1 %v1780_v7  ;;  %v1864_v45 = vld [vmem:[%s2200_s4 + $0xa4] ss:$8 sps:$4 sm:$0xff]   ;;  %v1871_v52 = vld [vmem:[%s2200_s4 + $0xa0] ss:$8 sps:$4 sm:$0xff]   ;;  %v1900_v40 = vld [vmem:[%s2200_s4 + $0xd4] ss:$8 sps:$4 sm:$0xff]  }
  0x2a   : > { %637 = vmatpush1.bf16.msra.mxu0 %v1371_v57  ;;  %2223 = vst [vmem:[#allocation9_spill] sm:$0xff] %v1864_v45  ;;  %2224 = vst [vmem:[#allocation10_spill] sm:$0xff] %v1871_v52  ;;  %v1876_v57 = vld [vmem:[%s2200_s4 + $0xb4] ss:$8 sps:$4 sm:$0xff]   ;;  %v1895_v60 = vld [vmem:[%s2200_s4 + $0xc0] ss:$8 sps:$4 sm:$0xff]  }
  0x2b   : > { %309 = vadd.xlane.f32.xlu1 %v308_v24  ;;  %306 = vadd.xlane.f32.xlu0 %v305_v25  ;;  %2225 = vst [vmem:[#allocation11_spill] sm:$0xff] %v1876_v57  ;;  %2228 = vst [vmem:[#allocation14_spill] sm:$0xff] %v1895_v60 }
  0x2c   : > { %638 = vmatprep.subr.bf16.mxu0 %v1372_v58  ;;  %1302 = vmatpush1.bf16.msra.mxu1 %v1787_v10  ;;  %2229 = vst [vmem:[#allocation15_spill] sm:$0xff] %v1900_v40 }
  0x2d   : > { %1287 = vmatprep.subr.bf16.mxu1 %v1792_v11 }
  0x2e   : > { %639 = vmatpush1.bf16.msra.mxu0 %v1374_v59 }
  0x2f   : > { %315 = vadd.xlane.f32.xlu1 %v314_v30  ;;  %312 = vadd.xlane.f32.xlu0 %v311_v31  ;;  %v1852_v31 = vld [vmem:[%s2200_s4 + $0x94] ss:$8 sps:$4 sm:$0xff]  }
  0x30   : > { %993 = vmatprep.subr.bf16.mxu0 %v1377_v61  ;;  %1303 = vmatpush1.bf16.msra.mxu1 %v1799_v13 }
  0x31   : > { %1288 = vmatprep.subr.bf16.mxu1 %v1804_v14 }
  0x33   : > { %321 = vadd.xlane.f32.xlu1 %v320_v36  ;;  %318 = vadd.xlane.f32.xlu0 %v317_v37 }
  0x34   : > { %1304 = vmatpush1.bf16.msra.mxu1 %v1811_v15 }
  0x35   : > { %1289 = vmatprep.subr.bf16.mxu1 %v1816_v16 }
  0x37   : > { %327 = vadd.xlane.f32.xlu1 %v326_v42  ;;  %324 = vadd.xlane.f32.xlu0 %v323_v43 }
  0x38   : > { %1305 = vmatpush1.bf16.msra.mxu1 %v1823_v20 }
  0x39   : > { %1290 = vmatprep.subr.bf16.mxu1 %v1828_v21 }
  0x3b   : > { %333 = vadd.xlane.f32.xlu1 %v332_v46  ;;  %330 = vadd.xlane.f32.xlu0 %v329_v47 }
  0x3c   : > { %1306 = vmatpush1.bf16.msra.mxu1 %v1835_v22 }
  0x3d   : > { %1291 = vmatprep.subr.bf16.mxu1 %v1840_v23 }
  0x40   : > { %1307 = vmatpush1.bf16.msra.mxu1 %v1847_v26 }
  0x41   : > { %1292 = vmatprep.subr.bf16.mxu1 %v1852_v31 }
  0x44   : > { %1308 = vmatpush1.bf16.msra.mxu1 %v1859_v38 }
  0x45   : > { %1293 = vmatprep.subr.bf16.mxu1 %v1864_v45 }
  0x48   : > { %1309 = vmatpush1.bf16.msra.mxu1 %v1871_v52 }
  0x49   : > { %1294 = vmatprep.subr.bf16.mxu1 %v1876_v57 }
  0xac   : > { %v295_v24 = vpop.xlane.xlu1 %294  ;;  %v289_v25 = vpop.xlane.xlu0 %288 }
  0xad   : > { %v347_v27 = vrot.slane %v295_v24, 4  ;;  %v335_v30 = vrot.slane %v289_v25, 4 }
  0xaf   : > { %v348_v32 = vadd.f32 %v347_v27, %v295_v24  ;;  %v336_v33 = vadd.f32 %v335_v30, %v289_v25 }
  0xb0   : > { %v298_v36 = vpop.xlane.xlu1 %297  ;;  %v292_v37 = vpop.xlane.xlu0 %291 }
  0xb1   : > { %v349_v39 = vrot.slane %v348_v32, 2  ;;  %v337_v42 = vrot.slane %v336_v33, 2  ;;  %v353_v43 = vrot.slane %v298_v36, 4  ;;  %v341_v44 = vrot.slane %v292_v37, 4 }
  0xb3   : > { %v350_v46 = vadd.f32 %v349_v39, %v348_v32  ;;  %v338_v47 = vadd.f32 %v337_v42, %v336_v33  ;;  %v354_v48 = vadd.f32 %v353_v43, %v298_v36  ;;  %v342_v49 = vadd.f32 %v341_v44, %v292_v37  ;;  %v1883_v37 = vld [vmem:[%s2200_s4 + $0xb0] ss:$8 sps:$4 sm:$0xff]   ;;  %v1888_v44 = vld [vmem:[%s2200_s4 + $0xc4] ss:$8 sps:$4 sm:$0xff]  }
  0xb4   : > { %v304_v50 = vpop.xlane.xlu1 %303  ;;  %v301_v51 = vpop.xlane.xlu0 %300  ;;  %2226 = vst [vmem:[#allocation12_spill] sm:$0xff] %v1883_v37  ;;  %2227 = vst [vmem:[#allocation13_spill] sm:$0xff] %v1888_v44  ;;  %1310 = vmatpush1.bf16.msra.mxu1 %v1883_v37 }
  0xb5   : > { %v351_v53 = vrot.slane %v350_v46, 1  ;;  %v339_v54 = vrot.slane %v338_v47, 1  ;;  %v355_v55 = vrot.slane %v354_v48, 2  ;;  %v343_v56 = vrot.slane %v342_v49, 2  ;;  %1295 = vmatprep.subr.bf16.mxu1 %v1888_v44 }
  0xb6   : > { %v365_v58 = vrot.slane %v304_v50, 4  ;;  %v359_v59 = vrot.slane %v301_v51, 4 }
  0xb7   : > { %v352_v61 = vadd.f32 %v351_v53, %v350_v46  ;;  %v340_v24 = vadd.f32 %v339_v54, %v338_v47  ;;  %v356_v25 = vadd.f32 %v355_v55, %v354_v48  ;;  %v344_v27 = vadd.f32 %v343_v56, %v342_v49 }
  0xb8   : > { %v366_v30 = vadd.f32 %v365_v58, %v304_v50  ;;  %v360_v32 = vadd.f32 %v359_v59, %v301_v51  ;;  %v310_v33 = vpop.xlane.xlu1 %309  ;;  %v307_v36 = vpop.xlane.xlu0 %306  ;;  %1311 = vmatpush1.bf16.msra.mxu1 %v1895_v60 }
  0xb9   : > { %v431_v39 = vmul.f32 0.0013020834, %v340_v24  ;;  %v357_v42 = vrot.slane %v356_v25, 1  ;;  %v345_v43 = vrot.slane %v344_v27, 1  ;;  %v377_v48 = vrot.slane %v310_v33, 4  ;;  %1296 = vmatprep.subr.bf16.mxu1 %v1900_v40 }
  0xba   : > { %v367_v46 = vrot.slane %v366_v30, 2  ;;  %v361_v47 = vrot.slane %v360_v32, 2  ;;  %v371_v49 = vrot.slane %v307_v36, 4  ;;  %v433_v50 = vmul.f32 0.0013020834, %v352_v61 }
  0xbb   : > { %v447_v51 = vadd.f32 1e-08, %v431_v39  ;;  %v358_v53 = vadd.f32 %v357_v42, %v356_v25  ;;  %v346_v54 = vadd.f32 %v345_v43, %v344_v27  ;;  %v378_v58 = vadd.f32 %v377_v48, %v310_v33 }
  0xbc   : > { %v368_v55 = vadd.f32 %v367_v46, %v366_v30  ;;  %v362_v56 = vadd.f32 %v361_v47, %v360_v32  ;;  %v372_v59 = vadd.f32 %v371_v49, %v307_v36  ;;  %v316_v24 = vpop.xlane.xlu1 %315  ;;  %v313_v39 = vpop.xlane.xlu0 %312 }
  0xbd   : > { %v434_v61 = vmul.f32 0.0013020834, %v358_v53  ;;  %v432_v25 = vmul.f32 0.0013020834, %v346_v54  ;;  %v389_v27 = vrot.slane %v316_v24, 4  ;;  %1423 = vrsqrt.f32 %v447_v51 }
  0xbe   : > { %v369_v30 = vrot.slane %v368_v55, 1  ;;  %v363_v32 = vrot.slane %v362_v56, 1  ;;  %v379_v33 = vrot.slane %v378_v58, 2  ;;  %v373_v43 = vrot.slane %v372_v59, 2  ;;  %v1907_v51 = vld [vmem:[%s2200_s4 + $0xd0] ss:$8 sps:$4 sm:$0xff]  }
  0xbf   : > { %v450_v36 = vadd.f32 1e-08, %v434_v61  ;;  %v448_v42 = vadd.f32 1e-08, %v432_v25  ;;  %v390_v46 = vadd.f32 %v389_v27, %v316_v24  ;;  %v383_v44 = vrot.slane %v313_v39, 4  ;;  %2230 = vst [vmem:[#allocation16_spill] sm:$0xff] %v1907_v51  ;;  %1312 = vmatpush1.bf16.msra.mxu1 %v1907_v51 }
  0xc0   : > { %v370_v47 = vadd.f32 %v369_v30, %v368_v55  ;;  %v364_v48 = vadd.f32 %v363_v32, %v362_v56  ;;  %v380_v49 = vadd.f32 %v379_v33, %v378_v58  ;;  %v322_v53 = vpop.xlane.xlu1 %321  ;;  %v449_v54 = vadd.f32 1e-08, %v433_v50  ;;  %v319_v37 = vpop.xlane.xlu0 %318 }
  0xc1   : > { %v374_v41 = vadd.f32 %v373_v43, %v372_v59  ;;  %1425 = vrsqrt.f32 %v448_v42  ;;  %v391_v25 = vrot.slane %v390_v46, 2  ;;  %v401_v60 = vrot.slane %v322_v53, 4 }
  0xc2   : > { %v381_v61 = vrot.slane %v380_v49, 1  ;;  %v436_v24 = vmul.f32 0.0013020834, %v370_v47  ;;  %v384_v56 = vadd.f32 %v383_v44, %v313_v39  ;;  %1427 = vrsqrt.f32 %v450_v36 }
  0xc3   : > { %v375_v55 = vrot.slane %v374_v41, 1  ;;  %v435_v58 = vmul.f32 0.0013020834, %v364_v48  ;;  %v395_v27 = vrot.slane %v319_v37, 4  ;;  %1429 = vrsqrt.f32 %v449_v54 }
  0xc4   : > { %v385_v30 = vrot.slane %v384_v56, 2  ;;  %v382_v32 = vadd.f32 %v381_v61, %v380_v49  ;;  %v392_v33 = vadd.f32 %v391_v25, %v390_v46  ;;  %v402_v40 = vadd.f32 %v401_v60, %v322_v53  ;;  %v328_v43 = vpop.xlane.xlu1 %327  ;;  %v325_v46 = vpop.xlane.xlu0 %324 }
  0xc5   : > { %v452_v50 = vadd.f32 1e-08, %v436_v24  ;;  %v376_v59 = vadd.f32 %v375_v55, %v374_v41  ;;  %v451_v57 = vadd.f32 1e-08, %v435_v58  ;;  %v396_v45 = vadd.f32 %v395_v27, %v319_v37  ;;  %v1914_v41 = vld [vmem:[%s2197_s1] sm:$0xff] }
  0xc6   : > { %v386_v52 = vadd.f32 %v385_v30, %v384_v56  ;;  %v438_v34 = vmul.f32 0.0013020834, %v382_v32  ;;  %v393_v51 = vrot.slane %v392_v33, 1  ;;  %v403_v47 = vrot.slane %v402_v40, 2 }
  0xc7   : > { %v1424_v42 = vpop.eup %1423  ;;  %v413_v35 = vrot.slane %v328_v43, 4  ;;  %1431 = vrsqrt.f32 %v452_v50  ;;  %v437_v44 = vmul.f32 0.0013020834, %v376_v59  ;;  %v397_v60 = vrot.slane %v396_v45, 2 }
  0xc8   : > { %v480_v39 = vmul.f32 %v1424_v42, %v1616_v1  ;;  %1433 = vrsqrt.f32 %v451_v57  ;;  %v387_v48 = vrot.slane %v386_v52, 1  ;;  %v454_v53 = vadd.f32 1e-08, %v438_v34  ;;  %v334_v30 = vpop.xlane.xlu1 %333 }
  0xc9   : > { %v394_v54 = vadd.f32 %v393_v51, %v392_v33  ;;  %v404_v61 = vadd.f32 %v403_v47, %v402_v40  ;;  %v414_v25 = vadd.f32 %v413_v35, %v328_v43  ;;  %v453_v24 = vadd.f32 1e-08, %v437_v44 }
  0xca   : > { %v496_v1 = vmul.f32 %v480_v39, %v1914_v41  ;;  %v407_v55 = vrot.slane %v325_v46, 4  ;;  %v388_v58 = vadd.f32 %v387_v48, %v386_v52  ;;  %v398_v27 = vadd.f32 %v397_v60, %v396_v45 }
  0xcb   : > { %v1426_v36 = vpop.eup %1425  ;;  %1435 = vrsqrt.f32 %v454_v53  ;;  %v440_v34 = vmul.f32 0.0013020834, %v394_v54  ;;  %v405_v51 = vrot.slane %v404_v61, 1  ;;  %v415_v35 = vrot.slane %v414_v25, 2 }
  0xcc   : > { %v481_v37 = vmul.f32 %v1426_v36, %v1628_v6  ;;  %v1428_v49 = vpop.eup %1427  ;;  %v408_v59 = vadd.f32 %v407_v55, %v325_v46  ;;  %v331_v6 = vpop.xlane.xlu0 %330  ;;  %1437 = vrsqrt.f32 %v453_v24  ;;  %v425_v33 = vrot.slane %v334_v30, 4 }
  0xcd   : > { %v1430_v56 = vpop.eup %1429  ;;  %v483_v50 = vmul.f32 %v1428_v49, %v1619_v2  ;;  %v439_v43 = vmul.f32 0.0013020834, %v388_v58  ;;  %v399_v42 = vrot.slane %v398_v27, 1  ;;  %v2231_v52 = vmov 0  }
  0xce   : > { %v497_v57 = vmul.f32 %v481_v37, %v1914_v41  ;;  %v482_v40 = vmul.f32 %v1430_v56, %v1613_v0  ;;  %v409_v45 = vrot.slane %v408_v59, 2  ;;  %v419_v47 = vrot.slane %v331_v6, 4 }
  0xcf   : > { %v499_v44 = vmul.f32 %v483_v50, %v1914_v41  ;;  %v456_v36 = vadd.f32 1e-08, %v440_v34  ;;  %v406_v48 = vadd.f32 %v405_v51, %v404_v61  ;;  %v416_v60 = vadd.f32 %v415_v35, %v414_v25 }
  0xd0   : > { %v512_v32 = vpack.c.bf16 %v497_v57, %v496_v1  ;;  %v498_v0 = vmul.f32 %v482_v40, %v1914_v41  ;;  %v426_v46 = vadd.f32 %v425_v33, %v334_v30  ;;  %v455_v37 = vadd.f32 1e-08, %v439_v43 }
  0xd1   : > { %v1432_v2 = vpop.eup %1431  ;;  %v400_v49 = vadd.f32 %v399_v42, %v398_v27  ;;  %v410_v53 = vadd.f32 %v409_v45, %v408_v59  ;;  %v420_v54 = vadd.f32 %v419_v47, %v331_v6  ;;  %1439 = vrsqrt.f32 %v456_v36 }
  0xd2   : > { %1235 = vmatmul.mubr.msk.bf16.vlgmr.msra.gmra.mrb[0].mxu0 %vm286_vm0, %v512_v32  ;;  %v1434_v39 = vpop.eup %1433  ;;  %v513_v24 = vpack.c.bf16 %v499_v44, %v498_v0  ;;  %v485_v1 = vmul.f32 %v1432_v2, %v1633_v8  ;;  %v417_v61 = vrot.slane %v416_v60, 1  ;;  %v427_v25 = vrot.slane %v426_v46, 2 }
  0xd3   : > { %670 = vmatprep.mubr.bf16.mxu0 %v2231_v52  ;;  %994 = vmatpush1.bf16.msra.mxu0 %v1751_v62  ;;  %v484_v62 = vmul.f32 %v1434_v39, %v1636_v9  ;;  %1441 = vrsqrt.f32 %v455_v37  ;;  %v441_v55 = vmul.f32 0.0013020834, %v400_v49  ;;  %v411_v56 = vrot.slane %v410_v53, 1  ;;  %v2233_v37 = vld [vmem:[#allocation5_spill] sm:$0xff] }
  0xd4   : > { %995 = vmatprep.subr.bf16.mxu0 %v1756_v63  ;;  %v442_v63 = vmul.f32 0.0013020834, %v406_v48  ;;  %v418_v27 = vadd.f32 %v417_v61, %v416_v60  ;;  %v428_v30 = vadd.f32 %v427_v25, %v426_v46  ;;  %v2238_v61 = vld [vmem:[#allocation8_spill] sm:$0xff] }
  0xd5   : > { %v1436_v57 = vpop.eup %1435  ;;  %v500_v8 = vmul.f32 %v484_v62, %v1914_v41  ;;  %v457_v32 = vadd.f32 1e-08, %v441_v55  ;;  %v412_v50 = vadd.f32 %v411_v56, %v410_v53  ;;  %v2234_v53 = vld [vmem:[#allocation9_spill] sm:$0xff]  ;;  %v2236_v62 = vld [vmem:[#allocation11_spill] sm:$0xff] }
  0xd6   : > { %v1438_v9 = vpop.eup %1437  ;;  %v458_v58 = vadd.f32 1e-08, %v442_v63  ;;  %v444_v51 = vmul.f32 0.0013020834, %v418_v27  ;;  %v429_v35 = vrot.slane %v428_v30, 1  ;;  %v2240_v56 = vld [vmem:[#allocation13_spill] sm:$0xff] }
  0xd7   : > { %996 = vmatpush1.bf16.msra.mxu0 %v1763_v3  ;;  %v421_v3 = vrot.slane %v420_v54, 2  ;;  %v486_v34 = vmul.f32 %v1438_v9, %v1650_v17 }
  0xd8   : > { %997 = vmatprep.subr.bf16.mxu0 %v1768_v4  ;;  %v501_v4 = vmul.f32 %v485_v1, %v1914_v41  ;;  %1443 = vrsqrt.f32 %v458_v58  ;;  %v430_v43 = vadd.f32 %v429_v35, %v428_v30  ;;  %v2237_v1 = vld [vmem:[#allocation12_spill] sm:$0xff]  ;;  %v1419_v30 = vld [vmem:[%s2200_s4 + $0xe4] ss:$8 sps:$4 sm:$0xff]  }
  0xd9   : > { %v422_v59 = vadd.f32 %v421_v3, %v420_v54  ;;  %1445 = vrsqrt.f32 %v457_v32  ;;  %v502_v33 = vmul.f32 %v486_v34, %v1914_v41  ;;  %v2241_v3 = vld [vmem:[#allocation14_spill] sm:$0xff]  ;;  %v2243_v58 = vld [vmem:[#allocation16_spill] sm:$0xff]  ;;  %1297 = vmatprep.subr.bf16.mxu1 %v1419_v30  ;;  %v532_v34 = vld [vmem:[%s2199_s3] sm:$0x3] }
  0xda   : > { %1236 = vmatmul.mubr.msk.bf16.gmra.mrb[4].mxu0 %vm286_vm0, %v513_v24  ;;  %v514_v6 = vpack.c.bf16 %v501_v4, %v500_v8  ;;  %v2242_v4 = vld [vmem:[#allocation15_spill] sm:$0xff] }
  0xdb   : > { %680 = vmatprep.mubr.bf16.mxu0 %v2231_v52  ;;  %998 = vmatpush1.bf16.msra.mxu0 %v1775_v5  ;;  %v487_v5 = vmul.f32 %v1436_v57, %v1641_v12  ;;  %v423_v40 = vrot.slane %v422_v59, 1  ;;  %v2239_v57 = vld [vmem:[#allocation7_spill] sm:$0xff] }
  0xdc   : > { %999 = vmatprep.subr.bf16.mxu0 %v1780_v7  ;;  %v443_v7 = vmul.f32 0.0013020834, %v412_v50  ;;  %v1420_v32 = vld [vmem:[%s2200_s4 + $0xf0] ss:$8 sps:$4 sm:$0xff]   ;;  %v534_v50 = vlaneseq }
  0xdd   : > { %v503_v17 = vmul.f32 %v487_v5, %v1914_v41  ;;  %v424_v45 = vadd.f32 %v423_v40, %v422_v59 }
  0xde   : > { %v459_v42 = vadd.f32 1e-08, %v443_v7  ;;  %v2001_v59 = vshrl.u32 %v534_v50, 7 }
  0xdf   : > { %1000 = vmatpush1.bf16.msra.mxu0 %v1787_v10  ;;  %v1440_v10 = vpop.eup %1439  ;;  %v515_v47 = vpack.c.bf16 %v503_v17, %v502_v33 }
  0xe0   : > { %1001 = vmatprep.subr.bf16.mxu0 %v1792_v11  ;;  %v1442_v12 = vpop.eup %1441  ;;  %v460_v11 = vadd.f32 1e-08, %v444_v51  ;;  %v489_v44 = vmul.f32 %v1440_v10, %v1653_v18  ;;  %v540_v5 = vsub.s32 1, %v2001_v59 }
  0xe1   : > { %v488_v2 = vmul.f32 %v1442_v12, %v1656_v19 }
  0xe2   : > { %1237 = vmatmul.mubr.msk.bf16.gmra.mrb[8].mxu0 %vm286_vm0, %v514_v6  ;;  %1447 = vrsqrt.f32 %v460_v11  ;;  %v1444_v39 = vpop.eup %1443  ;;  %v505_v36 = vmul.f32 %v489_v44, %v1914_v41  ;;  %v536_v6 = vsub.s32 0, %v2001_v59  ;;  %v2014_v35 = vrot.slane %v532_v34, %v540_v5 }
  0xe3   : > { %690 = vmatprep.mubr.bf16.mxu0 %v2231_v52  ;;  %1002 = vmatpush1.bf16.msra.mxu0 %v1799_v13  ;;  %v446_v13 = vmul.f32 0.0013020834, %v430_v43  ;;  %1449 = vrsqrt.f32 %v459_v42  ;;  %v1446_v18 = vpop.eup %1445  ;;  %v491_v0 = vmul.f32 %v1444_v39, %v1671_v28 }
  0xe4   : > { %1003 = vmatprep.subr.bf16.mxu0 %v1804_v14  ;;  %v445_v14 = vmul.f32 0.0013020834, %v424_v45  ;;  %v490_v60 = vmul.f32 %v1446_v18, %v1674_v29  ;;  %v2010_v51 = vrot.slane %v532_v34, %v536_v6 }
  0xe5   : > { %v462_v19 = vadd.f32 1e-08, %v446_v13 }
  0xe7   : > { %1004 = vmatpush1.bf16.msra.mxu0 %v1811_v15  ;;  %v504_v15 = vmul.f32 %v488_v2, %v1914_v41  ;;  %1451 = vrsqrt.f32 %v462_v19 }
  0xe8   : > { %1005 = vmatprep.subr.bf16.mxu0 %v1816_v16  ;;  %v461_v16 = vadd.f32 1e-08, %v445_v14 }
  0xe9   : > { %v516_v48 = vpack.c.bf16 %v505_v36, %v504_v15 }
  0xea   : > { %1238 = vmatmul.mubr.msk.bf16.gmra.mrb[12].mxu0 %vm286_vm0, %v515_v47  ;;  %1453 = vrsqrt.f32 %v461_v16 }
  0xeb   : > { %700 = vmatprep.mubr.bf16.mxu0 %v2231_v52  ;;  %1006 = vmatpush1.bf16.msra.mxu0 %v1823_v20 }
  0xec   : > { %1007 = vmatprep.subr.bf16.mxu0 %v1828_v21  ;;  %v1448_v20 = vpop.eup %1447  ;;  %v506_v21 = vmul.f32 %v490_v60, %v1914_v41 }
  0xed   : > { %v1450_v29 = vpop.eup %1449  ;;  %v493_v49 = vmul.f32 %v1448_v20, %v2233_v37 }
  0xef   : > { %1008 = vmatpush1.bf16.msra.mxu0 %v1835_v22  ;;  %v507_v22 = vmul.f32 %v491_v0, %v1914_v41 }
  0xf0   : > { %1009 = vmatprep.subr.bf16.mxu0 %v1840_v23  ;;  %v2232_v23 = vld [vmem:[#allocation6_spill] sm:$0xff] }
  0xf1   : > { %v517_v28 = vpack.c.bf16 %v507_v22, %v506_v21  ;;  %v492_v46 = vmul.f32 %v1450_v29, %v2232_v23  ;;  %v1452_v54 = vpop.eup %1451 }
  0xf2   : > { %1239 = vmatmul.mubr.msk.bf16.gmra.mrb[16].mxu0 %vm286_vm0, %v516_v48  ;;  %v495_v55 = vmul.f32 %v1452_v54, %v2239_v57 }
  0xf3   : > { %710 = vmatprep.mubr.bf16.mxu0 %v2231_v52  ;;  %1010 = vmatpush1.bf16.msra.mxu0 %v1847_v26  ;;  %v2235_v26 = vld [vmem:[#allocation10_spill] sm:$0xff]  ;;  %v508_v24 = vmul.f32 %v492_v46, %v1914_v41 }
  0xf4   : > { %1011 = vmatprep.subr.bf16.mxu0 %v1852_v31  ;;  %v509_v31 = vmul.f32 %v493_v49, %v1914_v41  ;;  %v511_v8 = vmul.f32 %v495_v55, %v1914_v41 }
  0xf6   : > { %v518_v63 = vpack.c.bf16 %v509_v31, %v508_v24 }
  0xf7   : > { %1012 = vmatpush1.bf16.msra.mxu0 %v1859_v38  ;;  %v1454_v38 = vpop.eup %1453 }
  0xf8   : > { %1013 = vmatprep.subr.bf16.mxu0 %v2234_v53  ;;  %v494_v25 = vmul.f32 %v1454_v38, %v2238_v61 }
  0xfa   : > { %1240 = vmatmul.mubr.msk.bf16.gmra.mrb[20].mxu0 %vm286_vm0, %v517_v28  ;;  %v510_v9 = vmul.f32 %v494_v25, %v1914_v41  ;;  %v1422_v41 = vld [vmem:[%s2200_s4 + $0xf4] ss:$8 sps:$4 sm:$0xff]  }
  0xfb   : > { %720 = vmatprep.mubr.bf16.mxu0 %v2231_v52  ;;  %1014 = vmatpush1.bf16.msra.mxu0 %v2235_v26 }
  0xfc   : > { %1015 = vmatprep.subr.bf16.mxu0 %v2236_v62  ;;  %v519_v27 = vpack.c.bf16 %v511_v8, %v510_v9 }
  0xff   : > { %1016 = vmatpush1.bf16.msra.mxu0 %v2237_v1 }
 0x100   : > { %1017 = vmatprep.subr.bf16.mxu0 %v2240_v56 }
 0x102   : > { %1241 = vmatmul.mubr.msk.bf16.gmra.mrb[24].mxu0 %vm286_vm0, %v518_v63 }
 0x103   : > { %730 = vmatprep.mubr.bf16.mxu0 %v2231_v52  ;;  %1018 = vmatpush1.bf16.msra.mxu0 %v2241_v3  ;;  %v1417_v52 = vld [vmem:[%s2200_s4 + $0xe0] ss:$8 sps:$4 sm:$0xff]  }
 0x104   : > { %1019 = vmatprep.subr.bf16.mxu0 %v2242_v4  ;;  %1313 = vmatpush1.bf16.msra.mxu1 %v1417_v52 }
 0x105   : > { %1298 = vmatprep.subr.bf16.mxu1 %v1422_v41 }
 0x107   : > { %1020 = vmatpush1.bf16.msra.mxu0 %v2243_v58 }
 0x108   : > { %1021 = vmatprep.subr.bf16.mxu0 %v1419_v30  ;;  %1314 = vmatpush1.bf16.msra.mxu1 %v1420_v32 }
 0x10a   : > { %1242 = vmatmul.mubr.msk.bf16.gmra.mrb[28].mxu0 %vm286_vm0, %v519_v27 }
 0x10b   : > { %1022 = vmatpush1.bf16.msra.mxu0 %v1417_v52 }
 0x10c   : > { %1023 = vmatprep.subr.bf16.mxu0 %v1422_v41 }
 0x10f   : > { %1024 = vmatpush1.bf16.msra.mxu0 %v1420_v32 }
 0x1a5   : > { %v662_v7 = vpop.f32.mrb[0].mxu0 }
 0x1a6   : > { %v663_v40 = vadd.f32 %v662_v7, %v2010_v51  ;;  %v664_v10 = vpop.f32.mrb[1].mxu0 }
 0x1a7   : > { %v665_v33 = vadd.f32 %v664_v10, %v2014_v35  ;;  %v666_v17 = vpop.f32.mrb[2].mxu0 }
 0x1a8   : > { %v667_v12 = vadd.f32 %v666_v17, %v2010_v51  ;;  %v668_v11 = vpop.f32.mrb[3].mxu0  ;;  %v741_v42 = vmax.f32 %v663_v40, 0.0 }
 0x1a9   : > { %v669_v43 = vadd.f32 %v668_v11, %v2014_v35  ;;  %v742_v47 = vmax.f32 %v665_v33, 0.0 }
 0x1aa   : > { %v743_v45 = vmax.f32 %v667_v12, 0.0 }
 0x1ab   : > { %v744_v2 = vmax.f32 %v669_v43, 0.0 }
 0x1ac   : > { %v773_v44 = vpack.c.bf16 %v743_v45, %v741_v42 }
 0x1ad   : > { %v774_v13 = vpack.c.bf16 %v744_v2, %v742_v47  ;;  %v672_v14 = vpop.f32.mrb[4].mxu0 }
 0x1ae   : > { %v673_v39 = vadd.f32 %v672_v14, %v2010_v51  ;;  %v674_v15 = vpop.f32.mrb[5].mxu0 }
 0x1af   : > { %v675_v36 = vadd.f32 %v674_v15, %v2014_v35  ;;  %v676_v18 = vpop.f32.mrb[6].mxu0  ;;  %1025 = vmatprep.mubr.bf16.mxu0 %v774_v13 }
 0x1b0   : > { %v677_v19 = vadd.f32 %v676_v18, %v2010_v51  ;;  %v678_v16 = vpop.f32.mrb[7].mxu0  ;;  %1026 = vmatmul.mubr.bf16.vlgmr.msra.gmra.mrb[32].mxu0 %v773_v44  ;;  %v745_v60 = vmax.f32 %v673_v39, 0.0 }
 0x1b1   : > { %v679_v48 = vadd.f32 %v678_v16, %v2014_v35  ;;  %v746_v20 = vmax.f32 %v675_v36, 0.0 }
 0x1b2   : > { %v747_v0 = vmax.f32 %v677_v19, 0.0 }
 0x1b3   : > { %v748_v21 = vmax.f32 %v679_v48, 0.0 }
 0x1b4   : > { %v775_v22 = vpack.c.bf16 %v747_v0, %v745_v60 }
 0x1b5   : > { %v776_v29 = vpack.c.bf16 %v748_v21, %v746_v20  ;;  %v682_v28 = vpop.f32.mrb[8].mxu0 }
 0x1b6   : > { %v683_v23 = vadd.f32 %v682_v28, %v2010_v51  ;;  %v684_v46 = vpop.f32.mrb[9].mxu0 }
 0x1b7   : > { %v685_v37 = vadd.f32 %v684_v46, %v2014_v35  ;;  %v686_v49 = vpop.f32.mrb[10].mxu0  ;;  %1035 = vmatprep.mubr.bf16.mxu0 %v776_v29 }
 0x1b8   : > { %v687_v53 = vadd.f32 %v686_v49, %v2010_v51  ;;  %v688_v26 = vpop.f32.mrb[11].mxu0  ;;  %1036 = vmatmul.mubr.bf16.gmra.mrb[36].mxu0 %v775_v22  ;;  %v749_v24 = vmax.f32 %v683_v23, 0.0 }
 0x1b9   : > { %v689_v54 = vadd.f32 %v688_v26, %v2014_v35  ;;  %v750_v62 = vmax.f32 %v685_v37, 0.0 }
 0x1ba   : > { %v751_v31 = vmax.f32 %v687_v53, 0.0 }
 0x1bb   : > { %v752_v38 = vmax.f32 %v689_v54, 0.0 }
 0x1bc   : > { %v777_v1 = vpack.c.bf16 %v751_v31, %v749_v24 }
 0x1bd   : > { %v692_v63 = vpop.f32.mrb[12].mxu0  ;;  %v778_v61 = vpack.c.bf16 %v752_v38, %v750_v62 }
 0x1be   : > { %v693_v25 = vadd.f32 %v692_v63, %v2010_v51  ;;  %v694_v57 = vpop.f32.mrb[13].mxu0 }
 0x1bf   : > { %v695_v55 = vadd.f32 %v694_v57, %v2014_v35  ;;  %v696_v56 = vpop.f32.mrb[14].mxu0  ;;  %1045 = vmatprep.mubr.bf16.mxu1 %v778_v61 }
 0x1c0   : > { %v697_v3 = vadd.f32 %v696_v56, %v2010_v51  ;;  %v698_v9 = vpop.f32.mrb[15].mxu0  ;;  %1046 = vmatmul.mubr.bf16.vlgmr.msra.gmra.mrb[0].mxu1 %v777_v1  ;;  %v753_v4 = vmax.f32 %v693_v25, 0.0 }
 0x1c1   : > { %v699_v8 = vadd.f32 %v698_v9, %v2014_v35  ;;  %v754_v27 = vmax.f32 %v695_v55, 0.0 }
 0x1c2   : > { %v755_v58 = vmax.f32 %v697_v3, 0.0 }
 0x1c3   : > { %v756_v30 = vmax.f32 %v699_v8, 0.0 }
 0x1c4   : > { %v779_v52 = vpack.c.bf16 %v755_v58, %v753_v4 }
 0x1c5   : > { %v780_v41 = vpack.c.bf16 %v756_v30, %v754_v27  ;;  %v702_v32 = vpop.f32.mrb[16].mxu0  ;;  %v821_v30 = vld [vmem:[%s2201_s5] sm:$0x3] }
 0x1c6   : > { %v703_v50 = vadd.f32 %v702_v32, %v2010_v51  ;;  %v704_v34 = vpop.f32.mrb[17].mxu0 }
 0x1c7   : > { %v705_v7 = vadd.f32 %v704_v34, %v2014_v35  ;;  %v706_v40 = vpop.f32.mrb[18].mxu0  ;;  %1055 = vmatprep.mubr.bf16.mxu1 %v780_v41 }
 0x1c8   : > { %v707_v10 = vadd.f32 %v706_v40, %v2010_v51  ;;  %v708_v33 = vpop.f32.mrb[19].mxu0  ;;  %1056 = vmatmul.mubr.bf16.gmra.mrb[4].mxu1 %v779_v52  ;;  %v757_v12 = vmax.f32 %v703_v50, 0.0 }
 0x1c9   : > { %v709_v17 = vadd.f32 %v708_v33, %v2014_v35  ;;  %v758_v43 = vmax.f32 %v705_v7, 0.0 }
 0x1ca   : > { %v759_v11 = vmax.f32 %v707_v10, 0.0 }
 0x1cb   : > { %v760_v42 = vmax.f32 %v709_v17, 0.0 }
 0x1cc   : > { %v781_v45 = vpack.c.bf16 %v759_v11, %v757_v12 }
 0x1cd   : > { %v782_v47 = vpack.c.bf16 %v760_v42, %v758_v43  ;;  %v712_v2 = vpop.f32.mrb[20].mxu0 }
 0x1ce   : > { %v713_v44 = vadd.f32 %v712_v2, %v2010_v51  ;;  %v714_v13 = vpop.f32.mrb[21].mxu0 }
 0x1cf   : > { %v715_v14 = vadd.f32 %v714_v13, %v2014_v35  ;;  %v716_v39 = vpop.f32.mrb[22].mxu0  ;;  %1065 = vmatprep.mubr.bf16.mxu1 %v782_v47 }
 0x1d0   : > { %v717_v15 = vadd.f32 %v716_v39, %v2010_v51  ;;  %v718_v36 = vpop.f32.mrb[23].mxu0  ;;  %1066 = vmatmul.mubr.bf16.gmra.mrb[8].mxu1 %v781_v45  ;;  %v761_v19 = vmax.f32 %v713_v44, 0.0 }
 0x1d1   : > { %v719_v18 = vadd.f32 %v718_v36, %v2014_v35  ;;  %v762_v48 = vmax.f32 %v715_v14, 0.0 }
 0x1d2   : > { %v763_v16 = vmax.f32 %v717_v15, 0.0 }
 0x1d3   : > { %v764_v60 = vmax.f32 %v719_v18, 0.0 }
 0x1d4   : > { %v783_v0 = vpack.c.bf16 %v763_v16, %v761_v19 }
 0x1d5   : > { %v784_v20 = vpack.c.bf16 %v764_v60, %v762_v48  ;;  %v722_v21 = vpop.f32.mrb[24].mxu0 }
 0x1d6   : > { %v723_v22 = vadd.f32 %v722_v21, %v2010_v51  ;;  %v724_v29 = vpop.f32.mrb[25].mxu0 }
 0x1d7   : > { %v725_v28 = vadd.f32 %v724_v29, %v2014_v35  ;;  %v726_v23 = vpop.f32.mrb[26].mxu0  ;;  %1075 = vmatprep.mubr.bf16.mxu1 %v784_v20 }
 0x1d8   : > { %v727_v46 = vadd.f32 %v726_v23, %v2010_v51  ;;  %v728_v37 = vpop.f32.mrb[27].mxu0  ;;  %1076 = vmatmul.mubr.bf16.gmra.mrb[12].mxu1 %v783_v0  ;;  %v765_v53 = vmax.f32 %v723_v22, 0.0 }
 0x1d9   : > { %v729_v49 = vadd.f32 %v728_v37, %v2014_v35  ;;  %v766_v54 = vmax.f32 %v725_v28, 0.0 }
 0x1da   : > { %v767_v26 = vmax.f32 %v727_v46, 0.0 }
 0x1db   : > { %v768_v24 = vmax.f32 %v729_v49, 0.0 }
 0x1dc   : > { %v785_v31 = vpack.c.bf16 %v767_v26, %v765_v53 }
 0x1dd   : > { %v786_v62 = vpack.c.bf16 %v768_v24, %v766_v54  ;;  %v732_v38 = vpop.f32.mrb[28].mxu0 }
 0x1de   : > { %v733_v1 = vadd.f32 %v732_v38, %v2010_v51  ;;  %v734_v63 = vpop.f32.mrb[29].mxu0 }
 0x1df   : > { %v735_v61 = vadd.f32 %v734_v63, %v2014_v35  ;;  %v736_v25 = vpop.f32.mrb[30].mxu0  ;;  %1085 = vmatprep.mubr.bf16.mxu1 %v786_v62 }
 0x1e0   : > { %v737_v57 = vadd.f32 %v736_v25, %v2010_v51  ;;  %v738_v55 = vpop.f32.mrb[31].mxu0  ;;  %1086 = vmatmul.mubr.bf16.gmra.mrb[16].mxu1 %v785_v31  ;;  %v769_v3 = vmax.f32 %v733_v1, 0.0  ;;  %v2056_v51 = vrot.slane %v821_v30, %v536_v6 }
 0x1e1   : > { %v739_v56 = vadd.f32 %v738_v55, %v2014_v35  ;;  %v770_v8 = vmax.f32 %v735_v61, 0.0  ;;  %v2060_v35 = vrot.slane %v821_v30, %v540_v5 }
 0x1e2   : > { %v771_v9 = vmax.f32 %v737_v57, 0.0 }
 0x1e3   : > { %v772_v4 = vmax.f32 %v739_v56, 0.0 }
 0x1e4   : > { %v787_v58 = vpack.c.bf16 %v771_v9, %v769_v3 }
 0x1e5   : > { %v788_v27 = vpack.c.bf16 %v772_v4, %v770_v8 }
 0x1e7   : > { %1095 = vmatprep.mubr.bf16.mxu1 %v788_v27 }
 0x1e8   : > { %1096 = vmatmul.mubr.bf16.gmra.mrb[20].mxu1 %v787_v58 }
 0x283   : > { %v1027_v52 = vpop.f32.mrb[32].mxu0 }
 0x284   : > { %v1028_v41 = vadd.f32 %v1027_v52, %v2056_v51  ;;  %v1029_v32 = vpop.f32.mrb[33].mxu0 }
 0x285   : > { %v1030_v50 = vadd.f32 %v1029_v32, %v2060_v35  ;;  %v1031_v34 = vpop.f32.mrb[34].mxu0 }
 0x286   : > { %1106 = vst [vmem:[%s2064_s20] sm:$0xff] %v1028_v41  ;;  %v1032_v59 = vadd.f32 %v1031_v34, %v2056_v51  ;;  %v1033_v6 = vpop.f32.mrb[35].mxu0 }
 0x287   : > { %1108 = vst.msk [vmem:[%s2064_s20 + $0x8] sm:$0xff] %vm1107_vm1, %v1030_v50  ;;  %v1034_v5 = vadd.f32 %v1033_v6, %v2060_v35 }
 0x288   : > { %1109 = vst [vmem:[%s2064_s20 + $0x10] sm:$0xff] %v1032_v59 }
 0x289   : > { %1110 = vst.msk [vmem:[%s2064_s20 + $0x18] sm:$0xff] %vm1107_vm1, %v1034_v5 }
 0x28b   : > { %v1037_v7 = vpop.f32.mrb[36].mxu0 }
 0x28c   : > { %v1038_v40 = vadd.f32 %v1037_v7, %v2056_v51  ;;  %v1039_v10 = vpop.f32.mrb[37].mxu0 }
 0x28d   : > { %v1040_v33 = vadd.f32 %v1039_v10, %v2060_v35  ;;  %v1041_v17 = vpop.f32.mrb[38].mxu0 }
 0x28e   : > { %1111 = vst [vmem:[%s2064_s20 + $0x20] sm:$0xff] %v1038_v40  ;;  %v1042_v12 = vadd.f32 %v1041_v17, %v2056_v51  ;;  %v1043_v11 = vpop.f32.mrb[39].mxu0 }
 0x28f   : > { %1112 = vst.msk [vmem:[%s2064_s20 + $0x28] sm:$0xff] %vm1107_vm1, %v1040_v33  ;;  %v1044_v43 = vadd.f32 %v1043_v11, %v2060_v35 }
 0x290   : > { %1113 = vst [vmem:[%s2064_s20 + $0x30] sm:$0xff] %v1042_v12 }
 0x291   : > { %1114 = vst.msk [vmem:[%s2064_s20 + $0x38] sm:$0xff] %vm1107_vm1, %v1044_v43 }
 0x293   : > { %v1047_v42 = vpop.f32.mrb[0].mxu1 }
 0x294   : > { %v1048_v45 = vadd.f32 %v1047_v42, %v2056_v51  ;;  %v1049_v47 = vpop.f32.mrb[1].mxu1 }
 0x295   : > { %v1050_v2 = vadd.f32 %v1049_v47, %v2060_v35  ;;  %v1051_v44 = vpop.f32.mrb[2].mxu1 }
 0x296   : > { %1115 = vst [vmem:[%s2064_s20 + $0x40] sm:$0xff] %v1048_v45  ;;  %v1052_v13 = vadd.f32 %v1051_v44, %v2056_v51  ;;  %v1053_v14 = vpop.f32.mrb[3].mxu1 }
 0x297   : > { %1116 = vst.msk [vmem:[%s2064_s20 + $0x48] sm:$0xff] %vm1107_vm1, %v1050_v2  ;;  %v1054_v39 = vadd.f32 %v1053_v14, %v2060_v35 }
 0x298   : > { %1117 = vst [vmem:[%s2064_s20 + $0x50] sm:$0xff] %v1052_v13 }
 0x299   : > { %1118 = vst.msk [vmem:[%s2064_s20 + $0x58] sm:$0xff] %vm1107_vm1, %v1054_v39 }
 0x29b   : > { %v1057_v15 = vpop.f32.mrb[4].mxu1 }
 0x29c   : > { %v1058_v36 = vadd.f32 %v1057_v15, %v2056_v51  ;;  %v1059_v18 = vpop.f32.mrb[5].mxu1 }
 0x29d   : > { %v1060_v19 = vadd.f32 %v1059_v18, %v2060_v35  ;;  %v1061_v16 = vpop.f32.mrb[6].mxu1 }
 0x29e   : > { %1119 = vst [vmem:[%s2064_s20 + $0x60] sm:$0xff] %v1058_v36  ;;  %v1062_v48 = vadd.f32 %v1061_v16, %v2056_v51  ;;  %v1063_v60 = vpop.f32.mrb[7].mxu1 }
 0x29f   : > { %1120 = vst.msk [vmem:[%s2064_s20 + $0x68] sm:$0xff] %vm1107_vm1, %v1060_v19  ;;  %v1064_v0 = vadd.f32 %v1063_v60, %v2060_v35 }
 0x2a0   : > { %1121 = vst [vmem:[%s2064_s20 + $0x70] sm:$0xff] %v1062_v48 }
 0x2a1   : > { %1122 = vst.msk [vmem:[%s2064_s20 + $0x78] sm:$0xff] %vm1107_vm1, %v1064_v0 }
 0x2a3   : > { %v1067_v20 = vpop.f32.mrb[8].mxu1 }
 0x2a4   : > { %v1068_v21 = vadd.f32 %v1067_v20, %v2056_v51  ;;  %v1069_v22 = vpop.f32.mrb[9].mxu1 }
 0x2a5   : > { %v1070_v29 = vadd.f32 %v1069_v22, %v2060_v35  ;;  %v1071_v28 = vpop.f32.mrb[10].mxu1 }
 0x2a6   : > { %1123 = vst [vmem:[%s2064_s20 + $0x80] sm:$0xff] %v1068_v21  ;;  %v1072_v23 = vadd.f32 %v1071_v28, %v2056_v51  ;;  %v1073_v46 = vpop.f32.mrb[11].mxu1 }
 0x2a7   : > { %1124 = vst.msk [vmem:[%s2064_s20 + $0x88] sm:$0xff] %vm1107_vm1, %v1070_v29  ;;  %v1074_v37 = vadd.f32 %v1073_v46, %v2060_v35 }
 0x2a8   : > { %1125 = vst [vmem:[%s2064_s20 + $0x90] sm:$0xff] %v1072_v23 }
 0x2a9   : > { %1126 = vst.msk [vmem:[%s2064_s20 + $0x98] sm:$0xff] %vm1107_vm1, %v1074_v37 }
 0x2ab   : > { %v1077_v49 = vpop.f32.mrb[12].mxu1 }
 0x2ac   : > { %v1078_v53 = vadd.f32 %v1077_v49, %v2056_v51  ;;  %v1079_v26 = vpop.f32.mrb[13].mxu1 }
 0x2ad   : > { %v1080_v54 = vadd.f32 %v1079_v26, %v2060_v35  ;;  %v1081_v24 = vpop.f32.mrb[14].mxu1 }
 0x2ae   : > { %1127 = vst [vmem:[%s2064_s20 + $0xa0] sm:$0xff] %v1078_v53  ;;  %v1082_v31 = vadd.f32 %v1081_v24, %v2056_v51  ;;  %v1083_v62 = vpop.f32.mrb[15].mxu1 }
 0x2af   : > { %1128 = vst.msk [vmem:[%s2064_s20 + $0xa8] sm:$0xff] %vm1107_vm1, %v1080_v54  ;;  %v1084_v38 = vadd.f32 %v1083_v62, %v2060_v35 }
 0x2b0   : > { %1129 = vst [vmem:[%s2064_s20 + $0xb0] sm:$0xff] %v1082_v31 }
 0x2b1   : > { %1130 = vst.msk [vmem:[%s2064_s20 + $0xb8] sm:$0xff] %vm1107_vm1, %v1084_v38 }
 0x2b3   : > { %v1087_v1 = vpop.f32.mrb[16].mxu1 }
 0x2b4   : > { %v1088_v63 = vadd.f32 %v1087_v1, %v2056_v51  ;;  %v1089_v61 = vpop.f32.mrb[17].mxu1 }
 0x2b5   : > { %v1090_v25 = vadd.f32 %v1089_v61, %v2060_v35  ;;  %v1091_v57 = vpop.f32.mrb[18].mxu1 }
 0x2b6   : > { %1131 = vst [vmem:[%s2064_s20 + $0xc0] sm:$0xff] %v1088_v63  ;;  %v1092_v55 = vadd.f32 %v1091_v57, %v2056_v51  ;;  %v1093_v56 = vpop.f32.mrb[19].mxu1 }
 0x2b7   : > { %1132 = vst.msk [vmem:[%s2064_s20 + $0xc8] sm:$0xff] %vm1107_vm1, %v1090_v25  ;;  %v1094_v3 = vadd.f32 %v1093_v56, %v2060_v35 }
 0x2b8   : > { %1133 = vst [vmem:[%s2064_s20 + $0xd0] sm:$0xff] %v1092_v55 }
 0x2b9   : > { %1134 = vst.msk [vmem:[%s2064_s20 + $0xd8] sm:$0xff] %vm1107_vm1, %v1094_v3 }
 0x2bb   : > { %v1097_v9 = vpop.f32.mrb[20].mxu1 }
 0x2bc   : > { %v1098_v8 = vadd.f32 %v1097_v9, %v2056_v51  ;;  %v1099_v4 = vpop.f32.mrb[21].mxu1 }
 0x2bd   : > { %v1100_v58 = vadd.f32 %v1099_v4, %v2060_v35  ;;  %v1101_v27 = vpop.f32.mrb[22].mxu1 }
 0x2be   : > { %1135 = vst [vmem:[%s2064_s20 + $0xe0] sm:$0xff] %v1098_v8  ;;  %v1102_v30 = vadd.f32 %v1101_v27, %v2056_v51  ;;  %v1103_v52 = vpop.f32.mrb[23].mxu1 }
 0x2bf   : > { %1136 = vst.msk [vmem:[%s2064_s20 + $0xe8] sm:$0xff] %vm1107_vm1, %v1100_v58  ;;  %v1104_v41 = vadd.f32 %v1103_v52, %v2060_v35 }
 0x2c0   : > { %1137 = vst [vmem:[%s2064_s20 + $0xf0] sm:$0xff] %v1102_v30 }
 0x2c1   : > { %1138 = vst.msk [vmem:[%s2064_s20 + $0xf8] sm:$0xff] %vm1107_vm1, %v1104_v41 }
 0x2c2   : > { %1468 = shalt.err (!%p1465_p3)
}
 0x2c3   : > { %s1469_s15 = scalar_lea.hbm %s2143_s10, 4096  ;;  %s1473_s18 = scalar_lea.hbm %s2202_s6, 8192 }
 0x2c4   : > { %p1470_p4 = scmp.ne.s32.totalorder %s2143_s10, %s1469_s15  ;;  %p1474_p9 = scmp.lt.u32.totalorder %s2143_s10, %s2202_s6 }
 0x2c5   : > { %p1475_p10 = scmp.lt.u32.totalorder %s1473_s18, %s1469_s15  ;;  %p1477_p12 = scmp.lt.u32.totalorder %s1469_s15, %s2143_s10 }
 0x2c6   : > { %p1471_p7 = pnand %p1470_p4, %p1596_p5 }
 0x2c7   : > { %p1476_p11 = por %p1475_p10, %p1474_p9 }
 0x2c8   : > { %p1472_p8 = pneg %p1471_p7 }
 0x2c9   : > { %p1478_p13 = por %p1477_p12, %p1476_p11 }
 0x2cb   : > { %p1479_p0 = pnand %p1478_p13, %p1472_p8 }
 0x2cd   : > { %1482 = shalt.err (!%p1479_p0)
}
 0x2ce   : > { %s1521_s26 = smov 256   ;;  %s1522_s29 = smov 16  }
 0x2cf   : > { %1315 = dma.vmem_to_hbm [thread:$0]  (%p1596_p5), %s2145_s28, 4096, %s2143_s10, %s2155_s25, %s1521_s26, %s1521_s26, %s1522_s29  }
 0x2d0 PF: > { %p1321_p1 = scmp.ge.s32.totalorder %s1517_s24, 2  ;;  %s1169_s9 = sand.u32 1, %s1505_s21  }
 0x2d1   : > { %s1170_s11 = scalar_lea.sflag [#allocation3], %s1169_s9 }
 0x2d2   : > { %p1318_p2 = pnand %p1321_p1, %p1600_p6 }
 0x2d4   : > { %1500 = dma.done.wait (!%p1318_p2), %s1170_s11, 4096  }
 0x2d5   : > { %1502 = vsyncadd (!%p1318_p2), %s1170_s11, 4294963200  ;;  %p16_p3 = scmp.ge.s32.totalorder %s1583_s27, 4   ;;  %s2244_s21 = smov %s1509_s22 }
 0x2d6   : > { %s2245_s22 = smov %s1513_s23  ;;  %s2246_s23 = smov %s1594_s30 }
 0x2d7   : > { %s2247_s24 = smov %s1583_s27  ;;  %18 = sbr.rel (!%p16_p3) target bundleno = 3 (0x3), region = 79 }
 0x2de   :  { %1175 = vsyncpa [#allocation3], 1 }
 0x2df   :  { %1177 = vsyncpa [#allocation3 + $0x1], 1 }

// kernel: tpu_custom_call.1
= control target key start
LH: loop header
LB: loop body
LE: loop exit
PB: predicated region body
PF: predicated region fallthrough
CT: control target
= control target key end

     0   :  { %11 = vsyncpa [#allocation3], 0  ;;  %s2196_s0 = inlined_call_operand.vmem [shape: f32[32,8,96], index: 0, kind: input, shape index: {}]   ;;  %s2197_s1 = inlined_call_operand.vmem [shape: f32[8,96], index: 1, kind: input, shape index: {}]   ;;  %s2198_s2 = inlined_call_operand.vmem [shape: bf16[96,256], index: 2, kind: input, shape index: {}]   ;;  %s2199_s3 = inlined_call_operand.vmem [shape: f32[1,256], index: 3, kind: input, shape index: {}]   ;;  %s2200_s4 = inlined_call_operand.vmem [shape: bf16[256,192], index: 4, kind: input, shape index: {}]   ;;  %s2201_s5 = inlined_call_operand.vmem [shape: f32[1,192], index: 5, kind: input, shape index: {}]   ;;  %s2202_s6 = inlined_call_operand.hbm [shape: f32[32,8,192], index: 6, kind: output, shape index: {}]  }
   0x1   :  { %13 = vsyncpa [#allocation3 + $0x1], 0  ;;  %s1558_s21 = smov 0   ;;  %s1560_s22 = smov 0  }
   0x2   :  { %s1562_s23 = smov 0   ;;  %s1564_s24 = smov 0  }
   0x3 LB: > { %s1579_s25 = sadd.s32 4294967295, %s1517_s24   ;;  %s1216_s26 = sadd.s32 4294967294, %s1517_s24   ;;  %s1517_s24 = sphi %s1564_s24, %s2247_s24   ;;  %s1513_s23 = sphi %s1562_s23, %s2246_s23   ;;  %s1509_s22 = sphi %s1560_s22, %s2245_s22   ;;  %s1505_s21 = sphi %s1558_s21, %s2244_s21  }
   0x4   : > { %s1583_s27 = sadd.s32 1, %s1517_s24   ;;  %s157_s28 = sadd.s32 1, %s1513_s23 }
   0x5   : > { %s154_s29 = ssub.s32 %s1517_s24, %s1583_s27  ;;  %p167_p0 = scmp.ne.s32.totalorder %s1513_s23, %s1509_s22 }
   0x6   : > { %p155_p1 = scmp.eq.s32.totalorder %s154_s29, 0  ;;  %p168_p2 = scmp.eq.s32.totalorder %s1579_s25, 1 }
   0x7   : > { %p173_p3 = scmp.ne.s32.totalorder %s1509_s22, %s1505_s21  ;;  %p174_p4 = scmp.eq.s32.totalorder %s1216_s26, 1 }
   0x8   : > { %s1594_s30 = scalar_select %p155_p1, %s1513_s23, %s157_s28  }
   0x9   : > { %p1596_p5 = por %p168_p2, %p167_p0  ;;  %p1600_p6 = por %p174_p4, %p173_p3 }
   0xa   : > { %p1219_p7 = scmp.ge.s32.totalorder %s1517_s24, 1  ;;  %p216_p8 = scmp.lt.s32.totalorder %s1517_s24, 3 }
   0xc   : > { %p217_p9 = pnand %p1219_p7, %p216_p8 }
   0xe   : > { %220 = sbr.rel (%p217_p9) target bundleno = 720 (0x2d0), region = 44 }
  0x15   : > { %s1221_s9 = sshll.u32 %s1579_s25, 4  ;;  %vm286_vm0 = vcmask 785408   ;;  %v1357_v48 = vld [vmem:[%s2198_s2 + $0x4] ss:$8 sps:$4 sm:$0xff]   ;;  %v1359_v49 = vld [vmem:[%s2198_s2] ss:$8 sps:$4 sm:$0xff]  }
  0x16   : > { %p247_p10 = scmp.lt.s32.totalorder %s1221_s9, 31  ;;  %628 = vmatprep.subr.bf16.mxu0 %v1357_v48  ;;  %v1360_v50 = vld [vmem:[%s2198_s2 + $0x14] ss:$8 sps:$4 sm:$0xff]   ;;  %v1362_v51 = vld [vmem:[%s2198_s2 + $0x10] ss:$8 sps:$4 sm:$0xff]   ;;  %v2203_v60 = vmov 0  }
  0x17   : > { %629 = vmatpush1.bf16.msra.mxu0 %v1359_v49  ;;  %v1363_v52 = vld [vmem:[%s2198_s2 + $0x24] ss:$8 sps:$4 sm:$0xff]   ;;  %v1365_v53 = vld [vmem:[%s2198_s2 + $0x20] ss:$8 sps:$4 sm:$0xff]   ;;  %v1366_v54 = vld [vmem:[%s2198_s2 + $0x34] ss:$8 sps:$4 sm:$0xff]   ;;  %660 = vmatprep.mubr.bf16.mxu0 %v2203_v60 }
  0x18   : > { %s2249_s9 = smov (!%p247_p10, %s1221_s9), 31  ;;  %630 = vmatprep.subr.bf16.mxu0 %v1360_v50  ;;  %v1368_v55 = vld [vmem:[%s2198_s2 + $0x30] ss:$8 sps:$4 sm:$0xff]   ;;  %v1369_v56 = vld [vmem:[%s2198_s2 + $0x44] ss:$8 sps:$4 sm:$0xff]   ;;  %s243_s16 = sand.u32 1, %s1509_s22  }
  0x19   : > { %s1222_s10 = sshll.u32 %s2249_s9, 3  ;;  %v1371_v57 = vld [vmem:[%s2198_s2 + $0x40] ss:$8 sps:$4 sm:$0xff]   ;;  %v1372_v58 = vld [vmem:[%s2198_s2 + $0x54] ss:$8 sps:$4 sm:$0xff]   ;;  %s1220_s19 = sshll.u32 %s243_s16, 8 }
  0x1a   : > { %s1610_s13 = scalar_lea.vmem %s2196_s0, %s1222_s10  ;;  %v1374_v59 = vld [vmem:[%s2198_s2 + $0x50] ss:$8 sps:$4 sm:$0xff]   ;;  %v1377_v61 = vld [vmem:[%s2200_s4 + $0x4] ss:$8 sps:$4 sm:$0xff]   ;;  %v1751_v62 = vld [vmem:[%s2200_s4] ss:$8 sps:$4 sm:$0xff]  }
  0x1b   : > { %v1613_v0 = vld [vmem:[%s1610_s13 + $0x10] sm:$0xff]  ;;  %v1616_v1 = vld [vmem:[%s1610_s13] sm:$0xff]  ;;  %v1619_v2 = vld [vmem:[%s1610_s13 + $0x18] sm:$0xff]  ;;  %631 = vmatpush1.bf16.msra.mxu0 %v1362_v51  ;;  %1283 = vmatprep.subr.bf16.mxu1 %v1377_v61  ;;  %vm1107_vm1 = vcmask 523264   ;;  %s2064_s20 = scalar_lea.vmem [#allocation2], %s1220_s19  ;;  %s1282_s26 = sshll.u32 %s1579_s25, 12 }
  0x1c   : > { %v272_v3 = vmul.f32 %v1613_v0, %v1613_v0  ;;  %v270_v4 = vmul.f32 %v1616_v1, %v1616_v1  ;;  %v273_v5 = vmul.f32 %v1619_v2, %v1619_v2  ;;  %v1628_v6 = vld [vmem:[%s1610_s13 + $0x8] sm:$0xff]  ;;  %v1636_v9 = vld [vmem:[%s1610_s13 + $0x20] sm:$0xff]  ;;  %v1641_v12 = vld [vmem:[%s1610_s13 + $0x38] sm:$0xff]  ;;  %632 = vmatprep.subr.bf16.mxu0 %v1363_v52  ;;  %1299 = vmatpush1.bf16.msra.mxu1 %v1751_v62  ;;  %s1154_s28 = sshll.u32 %s2064_s20, 4  ;;  %s2143_s10 = scalar_lea.hbm %s2202_s6, %s1282_s26  ;;  %s2145_s28 = int_to_ptr.vmem [resolvable:$true] %s1154_s28 }
  0x1d   : > { %v271_v7 = vmul.f32 %v1628_v6, %v1628_v6  ;;  %v1633_v8 = vld [vmem:[%s1610_s13 + $0x28] sm:$0xff]  ;;  %v274_v16 = vmul.f32 %v1636_v9, %v1636_v9  ;;  %v1650_v17 = vld [vmem:[%s1610_s13 + $0x30] sm:$0xff]  ;;  %v1656_v19 = vld [vmem:[%s1610_s13 + $0x40] sm:$0xff]  ;;  %v277_v22 = vmul.f32 %v1641_v12, %v1641_v12  ;;  %s2155_s25 = scalar_lea.sflag [#allocation3], %s243_s16  ;;  %s1455_s11 = scalar_lea.vmem %s2145_s28, 4096 }
  0x1e   : > { %v293_v10 = vsel %vm286_vm0, %v272_v3, 0.0  ;;  %v287_v11 = vsel %vm286_vm0, %v270_v4, 0.0  ;;  %v296_v13 = vsel %vm286_vm0, %v273_v5, 0.0  ;;  %v275_v15 = vmul.f32 %v1633_v8, %v1633_v8  ;;  %v1653_v18 = vld [vmem:[%s1610_s13 + $0x48] sm:$0xff]  ;;  %v1671_v28 = vld [vmem:[%s1610_s13 + $0x58] sm:$0xff]  ;;  %v1674_v29 = vld [vmem:[%s1610_s13 + $0x50] sm:$0xff]  ;;  %p1456_p11 = scmp.ne.s32.totalorder %s2145_s28, %s1455_s11 }
  0x1f   : > { %294 = vadd.xlane.f32.xlu1 %v293_v10  ;;  %288 = vadd.xlane.f32.xlu0 %v287_v11  ;;  %v290_v14 = vsel %vm286_vm0, %v271_v7, 0.0  ;;  %v299_v21 = vsel %vm286_vm0, %v274_v16, 0.0  ;;  %v276_v23 = vmul.f32 %v1650_v17, %v1650_v17  ;;  %v308_v24 = vsel %vm286_vm0, %v277_v22, 0.0  ;;  %v1683_v34 = vld [vmem:[%s1610_s13 + $0x68] sm:$0xff]  ;;  %v1686_v35 = vld [vmem:[%s1610_s13 + $0x60] sm:$0xff]  ;;  %v1695_v40 = vld [vmem:[%s1610_s13 + $0x78] sm:$0xff] }
  0x20   : > { %v302_v20 = vsel %vm286_vm0, %v275_v15, 0.0  ;;  %v279_v26 = vmul.f32 %v1653_v18, %v1653_v18  ;;  %v278_v27 = vmul.f32 %v1656_v19, %v1656_v19  ;;  %v281_v32 = vmul.f32 %v1671_v28, %v1671_v28  ;;  %2219 = vst [vmem:[#allocation5_spill] sm:$0xff] %v1683_v34  ;;  %2220 = vst [vmem:[#allocation6_spill] sm:$0xff] %v1686_v35  ;;  %v1698_v41 = vld [vmem:[%s1610_s13 + $0x70] sm:$0xff]  ;;  %v1768_v4 = vld [vmem:[%s2200_s4 + $0x24] ss:$8 sps:$4 sm:$0xff]   ;;  %p1457_p12 = pnand %p1456_p11, %p1596_p5 }
  0x21   : > { %v305_v25 = vsel %vm286_vm0, %v276_v23, 0.0  ;;  %v280_v33 = vmul.f32 %v1674_v29, %v1674_v29  ;;  %v283_v38 = vmul.f32 %v1683_v34, %v1683_v34  ;;  %v282_v39 = vmul.f32 %v1686_v35, %v1686_v35  ;;  %2221 = vst [vmem:[#allocation7_spill] sm:$0xff] %v1695_v40  ;;  %2222 = vst [vmem:[#allocation8_spill] sm:$0xff] %v1698_v41  ;;  %v1756_v63 = vld [vmem:[%s2200_s4 + $0x14] ss:$8 sps:$4 sm:$0xff]   ;;  %s1520_s12 = smov [#allocation2]  }
  0x22   : > { %v314_v30 = vsel %vm286_vm0, %v279_v26, 0.0  ;;  %v311_v31 = vsel %vm286_vm0, %v278_v27, 0.0  ;;  %v320_v36 = vsel %vm286_vm0, %v281_v32, 0.0  ;;  %v285_v44 = vmul.f32 %v1695_v40, %v1695_v40  ;;  %633 = vmatpush1.bf16.msra.mxu0 %v1365_v53  ;;  %1284 = vmatprep.subr.bf16.mxu1 %v1756_v63  ;;  %v1763_v3 = vld [vmem:[%s2200_s4 + $0x10] ss:$8 sps:$4 sm:$0xff]   ;;  %p1458_p13 = pneg %p1457_p12  ;;  %s1459_s13 = sshll.u32 %s1520_s12, 4  ;;  %s1460_s13 = int_to_ptr.vmem [resolvable:$false] %s1459_s13 }
  0x23   : > { %297 = vadd.xlane.f32.xlu1 %v296_v13  ;;  %291 = vadd.xlane.f32.xlu0 %v290_v14  ;;  %v317_v37 = vsel %vm286_vm0, %v280_v33, 0.0  ;;  %v326_v42 = vsel %vm286_vm0, %v283_v38, 0.0  ;;  %v323_v43 = vsel %vm286_vm0, %v282_v39, 0.0  ;;  %v284_v45 = vmul.f32 %v1698_v41, %v1698_v41  ;;  %v1775_v5 = vld [vmem:[%s2200_s4 + $0x20] ss:$8 sps:$4 sm:$0xff]   ;;  %s1461_s14 = scalar_lea.vmem %s1460_s13, 8192  ;;  %p1462_p0 = scmp.lt.s32.totalorder %s2145_s28, %s1460_s13 }
  0x24   : > { %v332_v46 = vsel %vm286_vm0, %v285_v44, 0.0  ;;  %634 = vmatprep.subr.bf16.mxu0 %v1366_v54  ;;  %1300 = vmatpush1.bf16.msra.mxu1 %v1763_v3  ;;  %v1780_v7 = vld [vmem:[%s2200_s4 + $0x34] ss:$8 sps:$4 sm:$0xff]   ;;  %v1787_v10 = vld [vmem:[%s2200_s4 + $0x30] ss:$8 sps:$4 sm:$0xff]   ;;  %p1463_p1 = scmp.lt.s32.totalorder %s1461_s14, %s1455_s11 }
  0x25   : > { %v329_v47 = vsel %vm286_vm0, %v284_v45, 0.0  ;;  %1285 = vmatprep.subr.bf16.mxu1 %v1768_v4  ;;  %v1792_v11 = vld [vmem:[%s2200_s4 + $0x44] ss:$8 sps:$4 sm:$0xff]   ;;  %v1799_v13 = vld [vmem:[%s2200_s4 + $0x40] ss:$8 sps:$4 sm:$0xff]  }
  0x26   : > { %635 = vmatpush1.bf16.msra.mxu0 %v1368_v55  ;;  %v1804_v14 = vld [vmem:[%s2200_s4 + $0x54] ss:$8 sps:$4 sm:$0xff]   ;;  %v1811_v15 = vld [vmem:[%s2200_s4 + $0x50] ss:$8 sps:$4 sm:$0xff]   ;;  %v1816_v16 = vld [vmem:[%s2200_s4 + $0x64] ss:$8 sps:$4 sm:$0xff]   ;;  %p1464_p2 = por %p1463_p1, %p1462_p0 }
  0x27   : > { %303 = vadd.xlane.f32.xlu1 %v302_v20  ;;  %300 = vadd.xlane.f32.xlu0 %v299_v21  ;;  %v1823_v20 = vld [vmem:[%s2200_s4 + $0x60] ss:$8 sps:$4 sm:$0xff]   ;;  %v1828_v21 = vld [vmem:[%s2200_s4 + $0x74] ss:$8 sps:$4 sm:$0xff]   ;;  %v1835_v22 = vld [vmem:[%s2200_s4 + $0x70] ss:$8 sps:$4 sm:$0xff]  }
  0x28   : > { %636 = vmatprep.subr.bf16.mxu0 %v1369_v56  ;;  %1301 = vmatpush1.bf16.msra.mxu1 %v1775_v5  ;;  %v1840_v23 = vld [vmem:[%s2200_s4 + $0x84] ss:$8 sps:$4 sm:$0xff]   ;;  %v1847_v26 = vld [vmem:[%s2200_s4 + $0x80] ss:$8 sps:$4 sm:$0xff]   ;;  %v1859_v38 = vld [vmem:[%s2200_s4 + $0x90] ss:$8 sps:$4 sm:$0xff]   ;;  %p1465_p3 = pnand %p1464_p2, %p1458_p13 }
  0x29   : > { %1286 = vmatprep.subr.bf16.mxu1 %v1780_v7  ;;  %v1864_v45 = vld [vmem:[%s2200_s4 + $0xa4] ss:$8 sps:$4 sm:$0xff]   ;;  %v1871_v52 = vld [vmem:[%s2200_s4 + $0xa0] ss:$8 sps:$4 sm:$0xff]   ;;  %v1900_v40 = vld [vmem:[%s2200_s4 + $0xd4] ss:$8 sps:$4 sm:$0xff]  }
  0x2a   : > { %637 = vmatpush1.bf16.msra.mxu0 %v1371_v57  ;;  %2223 = vst [vmem:[#allocation9_spill] sm:$0xff] %v1864_v45  ;;  %2224 = vst [vmem:[#allocation10_spill] sm:$0xff] %v1871_v52  ;;  %v1876_v57 = vld [vmem:[%s2200_s4 + $0xb4] ss:$8 sps:$4 sm:$0xff]   ;;  %v1895_v60 = vld [vmem:[%s2200_s4 + $0xc0] ss:$8 sps:$4 sm:$0xff]  }
  0x2b   : > { %309 = vadd.xlane.f32.xlu1 %v308_v24  ;;  %306 = vadd.xlane.f32.xlu0 %v305_v25  ;;  %2225 = vst [vmem:[#allocation11_spill] sm:$0xff] %v1876_v57  ;;  %2228 = vst [vmem:[#allocation14_spill] sm:$0xff] %v1895_v60 }
  0x2c   : > { %638 = vmatprep.subr.bf16.mxu0 %v1372_v58  ;;  %1302 = vmatpush1.bf16.msra.mxu1 %v1787_v10  ;;  %2229 = vst [vmem:[#allocation15_spill] sm:$0xff] %v1900_v40 }
  0x2d   : > { %1287 = vmatprep.subr.bf16.mxu1 %v1792_v11 }
  0x2e   : > { %639 = vmatpush1.bf16.msra.mxu0 %v1374_v59 }
  0x2f   : > { %315 = vadd.xlane.f32.xlu1 %v314_v30  ;;  %312 = vadd.xlane.f32.xlu0 %v311_v31  ;;  %v1852_v31 = vld [vmem:[%s2200_s4 + $0x94] ss:$8 sps:$4 sm:$0xff]  }
  0x30   : > { %993 = vmatprep.subr.bf16.mxu0 %v1377_v61  ;;  %1303 = vmatpush1.bf16.msra.mxu1 %v1799_v13 }
  0x31   : > { %1288 = vmatprep.subr.bf16.mxu1 %v1804_v14 }
  0x33   : > { %321 = vadd.xlane.f32.xlu1 %v320_v36  ;;  %318 = vadd.xlane.f32.xlu0 %v317_v37 }
  0x34   : > { %1304 = vmatpush1.bf16.msra.mxu1 %v1811_v15 }
  0x35   : > { %1289 = vmatprep.subr.bf16.mxu1 %v1816_v16 }
  0x37   : > { %327 = vadd.xlane.f32.xlu1 %v326_v42  ;;  %324 = vadd.xlane.f32.xlu0 %v323_v43 }
  0x38   : > { %1305 = vmatpush1.bf16.msra.mxu1 %v1823_v20 }
  0x39   : > { %1290 = vmatprep.subr.bf16.mxu1 %v1828_v21 }
  0x3b   : > { %333 = vadd.xlane.f32.xlu1 %v332_v46  ;;  %330 = vadd.xlane.f32.xlu0 %v329_v47 }
  0x3c   : > { %1306 = vmatpush1.bf16.msra.mxu1 %v1835_v22 }
  0x3d   : > { %1291 = vmatprep.subr.bf16.mxu1 %v1840_v23 }
  0x40   : > { %1307 = vmatpush1.bf16.msra.mxu1 %v1847_v26 }
  0x41   : > { %1292 = vmatprep.subr.bf16.mxu1 %v1852_v31 }
  0x44   : > { %1308 = vmatpush1.bf16.msra.mxu1 %v1859_v38 }
  0x45   : > { %1293 = vmatprep.subr.bf16.mxu1 %v1864_v45 }
  0x48   : > { %1309 = vmatpush1.bf16.msra.mxu1 %v1871_v52 }
  0x49   : > { %1294 = vmatprep.subr.bf16.mxu1 %v1876_v57 }
  0xac   : > { %v295_v24 = vpop.xlane.xlu1 %294  ;;  %v289_v25 = vpop.xlane.xlu0 %288 }
  0xad   : > { %v347_v27 = vrot.slane %v295_v24, 4  ;;  %v335_v30 = vrot.slane %v289_v25, 4 }
  0xaf   : > { %v348_v32 = vadd.f32 %v347_v27, %v295_v24  ;;  %v336_v33 = vadd.f32 %v335_v30, %v289_v25 }
  0xb0   : > { %v298_v36 = vpop.xlane.xlu1 %297  ;;  %v292_v37 = vpop.xlane.xlu0 %291 }
  0xb1   : > { %v349_v39 = vrot.slane %v348_v32, 2  ;;  %v337_v42 = vrot.slane %v336_v33, 2  ;;  %v353_v43 = vrot.slane %v298_v36, 4  ;;  %v341_v44 = vrot.slane %v292_v37, 4 }
  0xb3   : > { %v350_v46 = vadd.f32 %v349_v39, %v348_v32  ;;  %v338_v47 = vadd.f32 %v337_v42, %v336_v33  ;;  %v354_v48 = vadd.f32 %v353_v43, %v298_v36  ;;  %v342_v49 = vadd.f32 %v341_v44, %v292_v37  ;;  %v1883_v37 = vld [vmem:[%s2200_s4 + $0xb0] ss:$8 sps:$4 sm:$0xff]   ;;  %v1888_v44 = vld [vmem:[%s2200_s4 + $0xc4] ss:$8 sps:$4 sm:$0xff]  }
  0xb4   : > { %v304_v50 = vpop.xlane.xlu1 %303  ;;  %v301_v51 = vpop.xlane.xlu0 %300  ;;  %2226 = vst [vmem:[#allocation12_spill] sm:$0xff] %v1883_v37  ;;  %2227 = vst [vmem:[#allocation13_spill] sm:$0xff] %v1888_v44  ;;  %1310 = vmatpush1.bf16.msra.mxu1 %v1883_v37 }
  0xb5   : > { %v351_v53 = vrot.slane %v350_v46, 1  ;;  %v339_v54 = vrot.slane %v338_v47, 1  ;;  %v355_v55 = vrot.slane %v354_v48, 2  ;;  %v343_v56 = vrot.slane %v342_v49, 2  ;;  %1295 = vmatprep.subr.bf16.mxu1 %v1888_v44 }
  0xb6   : > { %v365_v58 = vrot.slane %v304_v50, 4  ;;  %v359_v59 = vrot.slane %v301_v51, 4 }
  0xb7   : > { %v352_v61 = vadd.f32 %v351_v53, %v350_v46  ;;  %v340_v24 = vadd.f32 %v339_v54, %v338_v47  ;;  %v356_v25 = vadd.f32 %v355_v55, %v354_v48  ;;  %v344_v27 = vadd.f32 %v343_v56, %v342_v49 }
  0xb8   : > { %v366_v30 = vadd.f32 %v365_v58, %v304_v50  ;;  %v360_v32 = vadd.f32 %v359_v59, %v301_v51  ;;  %v310_v33 = vpop.xlane.xlu1 %309  ;;  %v307_v36 = vpop.xlane.xlu0 %306  ;;  %1311 = vmatpush1.bf16.msra.mxu1 %v1895_v60 }
  0xb9   : > { %v431_v39 = vmul.f32 0.0013020834, %v340_v24  ;;  %v357_v42 = vrot.slane %v356_v25, 1  ;;  %v345_v43 = vrot.slane %v344_v27, 1  ;;  %v377_v48 = vrot.slane %v310_v33, 4  ;;  %1296 = vmatprep.subr.bf16.mxu1 %v1900_v40 }
  0xba   : > { %v367_v46 = vrot.slane %v366_v30, 2  ;;  %v361_v47 = vrot.slane %v360_v32, 2  ;;  %v371_v49 = vrot.slane %v307_v36, 4  ;;  %v433_v50 = vmul.f32 0.0013020834, %v352_v61 }
  0xbb   : > { %v447_v51 = vadd.f32 1e-08, %v431_v39  ;;  %v358_v53 = vadd.f32 %v357_v42, %v356_v25  ;;  %v346_v54 = vadd.f32 %v345_v43, %v344_v27  ;;  %v378_v58 = vadd.f32 %v377_v48, %v310_v33 }
  0xbc   : > { %v368_v55 = vadd.f32 %v367_v46, %v366_v30  ;;  %v362_v56 = vadd.f32 %v361_v47, %v360_v32  ;;  %v372_v59 = vadd.f32 %v371_v49, %v307_v36  ;;  %v316_v24 = vpop.xlane.xlu1 %315  ;;  %v313_v39 = vpop.xlane.xlu0 %312 }
  0xbd   : > { %v434_v61 = vmul.f32 0.0013020834, %v358_v53  ;;  %v432_v25 = vmul.f32 0.0013020834, %v346_v54  ;;  %v389_v27 = vrot.slane %v316_v24, 4  ;;  %1423 = vrsqrt.f32 %v447_v51 }
  0xbe   : > { %v369_v30 = vrot.slane %v368_v55, 1  ;;  %v363_v32 = vrot.slane %v362_v56, 1  ;;  %v379_v33 = vrot.slane %v378_v58, 2  ;;  %v373_v43 = vrot.slane %v372_v59, 2  ;;  %v1907_v51 = vld [vmem:[%s2200_s4 + $0xd0] ss:$8 sps:$4 sm:$0xff]  }
  0xbf   : > { %v450_v36 = vadd.f32 1e-08, %v434_v61  ;;  %v448_v42 = vadd.f32 1e-08, %v432_v25  ;;  %v390_v46 = vadd.f32 %v389_v27, %v316_v24  ;;  %v383_v44 = vrot.slane %v313_v39, 4  ;;  %2230 = vst [vmem:[#allocation16_spill] sm:$0xff] %v1907_v51  ;;  %1312 = vmatpush1.bf16.msra.mxu1 %v1907_v51 }
  0xc0   : > { %v370_v47 = vadd.f32 %v369_v30, %v368_v55  ;;  %v364_v48 = vadd.f32 %v363_v32, %v362_v56  ;;  %v380_v49 = vadd.f32 %v379_v33, %v378_v58  ;;  %v322_v53 = vpop.xlane.xlu1 %321  ;;  %v449_v54 = vadd.f32 1e-08, %v433_v50  ;;  %v319_v37 = vpop.xlane.xlu0 %318 }
  0xc1   : > { %v374_v41 = vadd.f32 %v373_v43, %v372_v59  ;;  %1425 = vrsqrt.f32 %v448_v42  ;;  %v391_v25 = vrot.slane %v390_v46, 2  ;;  %v401_v60 = vrot.slane %v322_v53, 4 }
  0xc2   : > { %v381_v61 = vrot.slane %v380_v49, 1  ;;  %v436_v24 = vmul.f32 0.0013020834, %v370_v47  ;;  %v384_v56 = vadd.f32 %v383_v44, %v313_v39  ;;  %1427 = vrsqrt.f32 %v450_v36 }
  0xc3   : > { %v375_v55 = vrot.slane %v374_v41, 1  ;;  %v435_v58 = vmul.f32 0.0013020834, %v364_v48  ;;  %v395_v27 = vrot.slane %v319_v37, 4  ;;  %1429 = vrsqrt.f32 %v449_v54 }
  0xc4   : > { %v385_v30 = vrot.slane %v384_v56, 2  ;;  %v382_v32 = vadd.f32 %v381_v61, %v380_v49  ;;  %v392_v33 = vadd.f32 %v391_v25, %v390_v46  ;;  %v402_v40 = vadd.f32 %v401_v60, %v322_v53  ;;  %v328_v43 = vpop.xlane.xlu1 %327  ;;  %v325_v46 = vpop.xlane.xlu0 %324 }
  0xc5   : > { %v452_v50 = vadd.f32 1e-08, %v436_v24  ;;  %v376_v59 = vadd.f32 %v375_v55, %v374_v41  ;;  %v451_v57 = vadd.f32 1e-08, %v435_v58  ;;  %v396_v45 = vadd.f32 %v395_v27, %v319_v37  ;;  %v1914_v41 = vld [vmem:[%s2197_s1] sm:$0xff] }
  0xc6   : > { %v386_v52 = vadd.f32 %v385_v30, %v384_v56  ;;  %v438_v34 = vmul.f32 0.0013020834, %v382_v32  ;;  %v393_v51 = vrot.slane %v392_v33, 1  ;;  %v403_v47 = vrot.slane %v402_v40, 2 }
  0xc7   : > { %v1424_v42 = vpop.eup %1423  ;;  %v413_v35 = vrot.slane %v328_v43, 4  ;;  %1431 = vrsqrt.f32 %v452_v50  ;;  %v437_v44 = vmul.f32 0.0013020834, %v376_v59  ;;  %v397_v60 = vrot.slane %v396_v45, 2 }
  0xc8   : > { %v480_v39 = vmul.f32 %v1424_v42, %v1616_v1  ;;  %1433 = vrsqrt.f32 %v451_v57  ;;  %v387_v48 = vrot.slane %v386_v52, 1  ;;  %v454_v53 = vadd.f32 1e-08, %v438_v34  ;;  %v334_v30 = vpop.xlane.xlu1 %333 }
  0xc9   : > { %v394_v54 = vadd.f32 %v393_v51, %v392_v33  ;;  %v404_v61 = vadd.f32 %v403_v47, %v402_v40  ;;  %v414_v25 = vadd.f32 %v413_v35, %v328_v43  ;;  %v453_v24 = vadd.f32 1e-08, %v437_v44 }
  0xca   : > { %v496_v1 = vmul.f32 %v480_v39, %v1914_v41  ;;  %v407_v55 = vrot.slane %v325_v46, 4  ;;  %v388_v58 = vadd.f32 %v387_v48, %v386_v52  ;;  %v398_v27 = vadd.f32 %v397_v60, %v396_v45 }
  0xcb   : > { %v1426_v36 = vpop.eup %1425  ;;  %1435 = vrsqrt.f32 %v454_v53  ;;  %v440_v34 = vmul.f32 0.0013020834, %v394_v54  ;;  %v405_v51 = vrot.slane %v404_v61, 1  ;;  %v415_v35 = vrot.slane %v414_v25, 2 }
  0xcc   : > { %v481_v37 = vmul.f32 %v1426_v36, %v1628_v6  ;;  %v1428_v49 = vpop.eup %1427  ;;  %v408_v59 = vadd.f32 %v407_v55, %v325_v46  ;;  %v331_v6 = vpop.xlane.xlu0 %330  ;;  %1437 = vrsqrt.f32 %v453_v24  ;;  %v425_v33 = vrot.slane %v334_v30, 4 }
  0xcd   : > { %v1430_v56 = vpop.eup %1429  ;;  %v483_v50 = vmul.f32 %v1428_v49, %v1619_v2  ;;  %v439_v43 = vmul.f32 0.0013020834, %v388_v58  ;;  %v399_v42 = vrot.slane %v398_v27, 1  ;;  %v2231_v52 = vmov 0  }
  0xce   : > { %v497_v57 = vmul.f32 %v481_v37, %v1914_v41  ;;  %v482_v40 = vmul.f32 %v1430_v56, %v1613_v0  ;;  %v409_v45 = vrot.slane %v408_v59, 2  ;;  %v419_v47 = vrot.slane %v331_v6, 4 }
  0xcf   : > { %v499_v44 = vmul.f32 %v483_v50, %v1914_v41  ;;  %v456_v36 = vadd.f32 1e-08, %v440_v34  ;;  %v406_v48 = vadd.f32 %v405_v51, %v404_v61  ;;  %v416_v60 = vadd.f32 %v415_v35, %v414_v25 }
  0xd0   : > { %v512_v32 = vpack.c.bf16 %v497_v57, %v496_v1  ;;  %v498_v0 = vmul.f32 %v482_v40, %v1914_v41  ;;  %v426_v46 = vadd.f32 %v425_v33, %v334_v30  ;;  %v455_v37 = vadd.f32 1e-08, %v439_v43 }
  0xd1   : > { %v1432_v2 = vpop.eup %1431  ;;  %v400_v49 = vadd.f32 %v399_v42, %v398_v27  ;;  %v410_v53 = vadd.f32 %v409_v45, %v408_v59  ;;  %v420_v54 = vadd.f32 %v419_v47, %v331_v6  ;;  %1439 = vrsqrt.f32 %v456_v36 }
  0xd2   : > { %1235 = vmatmul.mubr.msk.bf16.vlgmr.msra.gmra.mrb[0].mxu0 %vm286_vm0, %v512_v32  ;;  %v1434_v39 = vpop.eup %1433  ;;  %v513_v24 = vpack.c.bf16 %v499_v44, %v498_v0  ;;  %v485_v1 = vmul.f32 %v1432_v2, %v1633_v8  ;;  %v417_v61 = vrot.slane %v416_v60, 1  ;;  %v427_v25 = vrot.slane %v426_v46, 2 }
  0xd3   : > { %670 = vmatprep.mubr.bf16.mxu0 %v2231_v52  ;;  %994 = vmatpush1.bf16.msra.mxu0 %v1751_v62  ;;  %v484_v62 = vmul.f32 %v1434_v39, %v1636_v9  ;;  %1441 = vrsqrt.f32 %v455_v37  ;;  %v441_v55 = vmul.f32 0.0013020834, %v400_v49  ;;  %v411_v56 = vrot.slane %v410_v53, 1  ;;  %v2233_v37 = vld [vmem:[#allocation5_spill] sm:$0xff] }
  0xd4   : > { %995 = vmatprep.subr.bf16.mxu0 %v1756_v63  ;;  %v442_v63 = vmul.f32 0.0013020834, %v406_v48  ;;  %v418_v27 = vadd.f32 %v417_v61, %v416_v60  ;;  %v428_v30 = vadd.f32 %v427_v25, %v426_v46  ;;  %v2238_v61 = vld [vmem:[#allocation8_spill] sm:$0xff] }
  0xd5   : > { %v1436_v57 = vpop.eup %1435  ;;  %v500_v8 = vmul.f32 %v484_v62, %v1914_v41  ;;  %v457_v32 = vadd.f32 1e-08, %v441_v55  ;;  %v412_v50 = vadd.f32 %v411_v56, %v410_v53  ;;  %v2234_v53 = vld [vmem:[#allocation9_spill] sm:$0xff]  ;;  %v2236_v62 = vld [vmem:[#allocation11_spill] sm:$0xff] }
  0xd6   : > { %v1438_v9 = vpop.eup %1437  ;;  %v458_v58 = vadd.f32 1e-08, %v442_v63  ;;  %v444_v51 = vmul.f32 0.0013020834, %v418_v27  ;;  %v429_v35 = vrot.slane %v428_v30, 1  ;;  %v2240_v56 = vld [vmem:[#allocation13_spill] sm:$0xff] }
  0xd7   : > { %996 = vmatpush1.bf16.msra.mxu0 %v1763_v3  ;;  %v421_v3 = vrot.slane %v420_v54, 2  ;;  %v486_v34 = vmul.f32 %v1438_v9, %v1650_v17 }
  0xd8   : > { %997 = vmatprep.subr.bf16.mxu0 %v1768_v4  ;;  %v501_v4 = vmul.f32 %v485_v1, %v1914_v41  ;;  %1443 = vrsqrt.f32 %v458_v58  ;;  %v430_v43 = vadd.f32 %v429_v35, %v428_v30  ;;  %v2237_v1 = vld [vmem:[#allocation12_spill] sm:$0xff]  ;;  %v1419_v30 = vld [vmem:[%s2200_s4 + $0xe4] ss:$8 sps:$4 sm:$0xff]  }
  0xd9   : > { %v422_v59 = vadd.f32 %v421_v3, %v420_v54  ;;  %1445 = vrsqrt.f32 %v457_v32  ;;  %v502_v33 = vmul.f32 %v486_v34, %v1914_v41  ;;  %v2241_v3 = vld [vmem:[#allocation14_spill] sm:$0xff]  ;;  %v2243_v58 = vld [vmem:[#allocation16_spill] sm:$0xff]  ;;  %1297 = vmatprep.subr.bf16.mxu1 %v1419_v30  ;;  %v532_v34 = vld [vmem:[%s2199_s3] sm:$0x3] }
  0xda   : > { %1236 = vmatmul.mubr.msk.bf16.gmra.mrb[4].mxu0 %vm286_vm0, %v513_v24  ;;  %v514_v6 = vpack.c.bf16 %v501_v4, %v500_v8  ;;  %v2242_v4 = vld [vmem:[#allocation15_spill] sm:$0xff] }
  0xdb   : > { %680 = vmatprep.mubr.bf16.mxu0 %v2231_v52  ;;  %998 = vmatpush1.bf16.msra.mxu0 %v1775_v5  ;;  %v487_v5 = vmul.f32 %v1436_v57, %v1641_v12  ;;  %v423_v40 = vrot.slane %v422_v59, 1  ;;  %v2239_v57 = vld [vmem:[#allocation7_spill] sm:$0xff] }
  0xdc   : > { %999 = vmatprep.subr.bf16.mxu0 %v1780_v7  ;;  %v443_v7 = vmul.f32 0.0013020834, %v412_v50  ;;  %v1420_v32 = vld [vmem:[%s2200_s4 + $0xf0] ss:$8 sps:$4 sm:$0xff]   ;;  %v534_v50 = vlaneseq }
  0xdd   : > { %v503_v17 = vmul.f32 %v487_v5, %v1914_v41  ;;  %v424_v45 = vadd.f32 %v423_v40, %v422_v59 }
  0xde   : > { %v459_v42 = vadd.f32 1e-08, %v443_v7  ;;  %v2001_v59 = vshrl.u32 %v534_v50, 7 }
  0xdf   : > { %1000 = vmatpush1.bf16.msra.mxu0 %v1787_v10  ;;  %v1440_v10 = vpop.eup %1439  ;;  %v515_v47 = vpack.c.bf16 %v503_v17, %v502_v33 }
  0xe0   : > { %1001 = vmatprep.subr.bf16.mxu0 %v1792_v11  ;;  %v1442_v12 = vpop.eup %1441  ;;  %v460_v11 = vadd.f32 1e-08, %v444_v51  ;;  %v489_v44 = vmul.f32 %v1440_v10, %v1653_v18  ;;  %v540_v5 = vsub.s32 1, %v2001_v59 }
  0xe1   : > { %v488_v2 = vmul.f32 %v1442_v12, %v1656_v19 }
  0xe2   : > { %1237 = vmatmul.mubr.msk.bf16.gmra.mrb[8].mxu0 %vm286_vm0, %v514_v6  ;;  %1447 = vrsqrt.f32 %v460_v11  ;;  %v1444_v39 = vpop.eup %1443  ;;  %v505_v36 = vmul.f32 %v489_v44, %v1914_v41  ;;  %v536_v6 = vsub.s32 0, %v2001_v59  ;;  %v2014_v35 = vrot.slane %v532_v34, %v540_v5 }
  0xe3   : > { %690 = vmatprep.mubr.bf16.mxu0 %v2231_v52  ;;  %1002 = vmatpush1.bf16.msra.mxu0 %v1799_v13  ;;  %v446_v13 = vmul.f32 0.0013020834, %v430_v43  ;;  %1449 = vrsqrt.f32 %v459_v42  ;;  %v1446_v18 = vpop.eup %1445  ;;  %v491_v0 = vmul.f32 %v1444_v39, %v1671_v28 }
  0xe4   : > { %1003 = vmatprep.subr.bf16.mxu0 %v1804_v14  ;;  %v445_v14 = vmul.f32 0.0013020834, %v424_v45  ;;  %v490_v60 = vmul.f32 %v1446_v18, %v1674_v29  ;;  %v2010_v51 = vrot.slane %v532_v34, %v536_v6 }
  0xe5   : > { %v462_v19 = vadd.f32 1e-08, %v446_v13 }
  0xe7   : > { %1004 = vmatpush1.bf16.msra.mxu0 %v1811_v15  ;;  %v504_v15 = vmul.f32 %v488_v2, %v1914_v41  ;;  %1451 = vrsqrt.f32 %v462_v19 }
  0xe8   : > { %1005 = vmatprep.subr.bf16.mxu0 %v1816_v16  ;;  %v461_v16 = vadd.f32 1e-08, %v445_v14 }
  0xe9   : > { %v516_v48 = vpack.c.bf16 %v505_v36, %v504_v15 }
  0xea   : > { %1238 = vmatmul.mubr.msk.bf16.gmra.mrb[12].mxu0 %vm286_vm0, %v515_v47  ;;  %1453 = vrsqrt.f32 %v461_v16 }
  0xeb   : > { %700 = vmatprep.mubr.bf16.mxu0 %v2231_v52  ;;  %1006 = vmatpush1.bf16.msra.mxu0 %v1823_v20 }
  0xec   : > { %1007 = vmatprep.subr.bf16.mxu0 %v1828_v21  ;;  %v1448_v20 = vpop.eup %1447  ;;  %v506_v21 = vmul.f32 %v490_v60, %v1914_v41 }
  0xed   : > { %v1450_v29 = vpop.eup %1449  ;;  %v493_v49 = vmul.f32 %v1448_v20, %v2233_v37 }
  0xef   : > { %1008 = vmatpush1.bf16.msra.mxu0 %v1835_v22  ;;  %v507_v22 = vmul.f32 %v491_v0, %v1914_v41 }
  0xf0   : > { %1009 = vmatprep.subr.bf16.mxu0 %v1840_v23  ;;  %v2232_v23 = vld [vmem:[#allocation6_spill] sm:$0xff] }
  0xf1   : > { %v517_v28 = vpack.c.bf16 %v507_v22, %v506_v21  ;;  %v492_v46 = vmul.f32 %v1450_v29, %v2232_v23  ;;  %v1452_v54 = vpop.eup %1451 }
  0xf2   : > { %1239 = vmatmul.mubr.msk.bf16.gmra.mrb[16].mxu0 %vm286_vm0, %v516_v48  ;;  %v495_v55 = vmul.f32 %v1452_v54, %v2239_v57 }
  0xf3   : > { %710 = vmatprep.mubr.bf16.mxu0 %v2231_v52  ;;  %1010 = vmatpush1.bf16.msra.mxu0 %v1847_v26  ;;  %v2235_v26 = vld [vmem:[#allocation10_spill] sm:$0xff]  ;;  %v508_v24 = vmul.f32 %v492_v46, %v1914_v41 }
  0xf4   : > { %1011 = vmatprep.subr.bf16.mxu0 %v1852_v31  ;;  %v509_v31 = vmul.f32 %v493_v49, %v1914_v41  ;;  %v511_v8 = vmul.f32 %v495_v55, %v1914_v41 }
  0xf6   : > { %v518_v63 = vpack.c.bf16 %v509_v31, %v508_v24 }
  0xf7   : > { %1012 = vmatpush1.bf16.msra.mxu0 %v1859_v38  ;;  %v1454_v38 = vpop.eup %1453 }
  0xf8   : > { %1013 = vmatprep.subr.bf16.mxu0 %v2234_v53  ;;  %v494_v25 = vmul.f32 %v1454_v38, %v2238_v61 }
  0xfa   : > { %1240 = vmatmul.mubr.msk.bf16.gmra.mrb[20].mxu0 %vm286_vm0, %v517_v28  ;;  %v510_v9 = vmul.f32 %v494_v25, %v1914_v41  ;;  %v1422_v41 = vld [vmem:[%s2200_s4 + $0xf4] ss:$8 sps:$4 sm:$0xff]  }
  0xfb   : > { %720 = vmatprep.mubr.bf16.mxu0 %v2231_v52  ;;  %1014 = vmatpush1.bf16.msra.mxu0 %v2235_v26 }
  0xfc   : > { %1015 = vmatprep.subr.bf16.mxu0 %v2236_v62  ;;  %v519_v27 = vpack.c.bf16 %v511_v8, %v510_v9 }
  0xff   : > { %1016 = vmatpush1.bf16.msra.mxu0 %v2237_v1 }
 0x100   : > { %1017 = vmatprep.subr.bf16.mxu0 %v2240_v56 }
 0x102   : > { %1241 = vmatmul.mubr.msk.bf16.gmra.mrb[24].mxu0 %vm286_vm0, %v518_v63 }
 0x103   : > { %730 = vmatprep.mubr.bf16.mxu0 %v2231_v52  ;;  %1018 = vmatpush1.bf16.msra.mxu0 %v2241_v3  ;;  %v1417_v52 = vld [vmem:[%s2200_s4 + $0xe0] ss:$8 sps:$4 sm:$0xff]  }
 0x104   : > { %1019 = vmatprep.subr.bf16.mxu0 %v2242_v4  ;;  %1313 = vmatpush1.bf16.msra.mxu1 %v1417_v52 }
 0x105   : > { %1298 = vmatprep.subr.bf16.mxu1 %v1422_v41 }
 0x107   : > { %1020 = vmatpush1.bf16.msra.mxu0 %v2243_v58 }
 0x108   : > { %1021 = vmatprep.subr.bf16.mxu0 %v1419_v30  ;;  %1314 = vmatpush1.bf16.msra.mxu1 %v1420_v32 }
 0x10a   : > { %1242 = vmatmul.mubr.msk.bf16.gmra.mrb[28].mxu0 %vm286_vm0, %v519_v27 }
 0x10b   : > { %1022 = vmatpush1.bf16.msra.mxu0 %v1417_v52 }
 0x10c   : > { %1023 = vmatprep.subr.bf16.mxu0 %v1422_v41 }
 0x10f   : > { %1024 = vmatpush1.bf16.msra.mxu0 %v1420_v32 }
 0x1a5   : > { %v662_v7 = vpop.f32.mrb[0].mxu0 }
 0x1a6   : > { %v663_v40 = vadd.f32 %v662_v7, %v2010_v51  ;;  %v664_v10 = vpop.f32.mrb[1].mxu0 }
 0x1a7   : > { %v665_v33 = vadd.f32 %v664_v10, %v2014_v35  ;;  %v666_v17 = vpop.f32.mrb[2].mxu0 }
 0x1a8   : > { %v667_v12 = vadd.f32 %v666_v17, %v2010_v51  ;;  %v668_v11 = vpop.f32.mrb[3].mxu0  ;;  %v741_v42 = vmax.f32 %v663_v40, 0.0 }
 0x1a9   : > { %v669_v43 = vadd.f32 %v668_v11, %v2014_v35  ;;  %v742_v47 = vmax.f32 %v665_v33, 0.0 }
 0x1aa   : > { %v743_v45 = vmax.f32 %v667_v12, 0.0 }
 0x1ab   : > { %v744_v2 = vmax.f32 %v669_v43, 0.0 }
 0x1ac   : > { %v773_v44 = vpack.c.bf16 %v743_v45, %v741_v42 }
 0x1ad   : > { %v774_v13 = vpack.c.bf16 %v744_v2, %v742_v47  ;;  %v672_v14 = vpop.f32.mrb[4].mxu0 }
 0x1ae   : > { %v673_v39 = vadd.f32 %v672_v14, %v2010_v51  ;;  %v674_v15 = vpop.f32.mrb[5].mxu0 }
 0x1af   : > { %v675_v36 = vadd.f32 %v674_v15, %v2014_v35  ;;  %v676_v18 = vpop.f32.mrb[6].mxu0  ;;  %1025 = vmatprep.mubr.bf16.mxu0 %v774_v13 }
 0x1b0   : > { %v677_v19 = vadd.f32 %v676_v18, %v2010_v51  ;;  %v678_v16 = vpop.f32.mrb[7].mxu0  ;;  %1026 = vmatmul.mubr.bf16.vlgmr.msra.gmra.mrb[32].mxu0 %v773_v44  ;;  %v745_v60 = vmax.f32 %v673_v39, 0.0 }
 0x1b1   : > { %v679_v48 = vadd.f32 %v678_v16, %v2014_v35  ;;  %v746_v20 = vmax.f32 %v675_v36, 0.0 }
 0x1b2   : > { %v747_v0 = vmax.f32 %v677_v19, 0.0 }
 0x1b3   : > { %v748_v21 = vmax.f32 %v679_v48, 0.0 }
 0x1b4   : > { %v775_v22 = vpack.c.bf16 %v747_v0, %v745_v60 }
 0x1b5   : > { %v776_v29 = vpack.c.bf16 %v748_v21, %v746_v20  ;;  %v682_v28 = vpop.f32.mrb[8].mxu0 }
 0x1b6   : > { %v683_v23 = vadd.f32 %v682_v28, %v2010_v51  ;;  %v684_v46 = vpop.f32.mrb[9].mxu0 }
 0x1b7   : > { %v685_v37 = vadd.f32 %v684_v46, %v2014_v35  ;;  %v686_v49 = vpop.f32.mrb[10].mxu0  ;;  %1035 = vmatprep.mubr.bf16.mxu0 %v776_v29 }
 0x1b8   : > { %v687_v53 = vadd.f32 %v686_v49, %v2010_v51  ;;  %v688_v26 = vpop.f32.mrb[11].mxu0  ;;  %1036 = vmatmul.mubr.bf16.gmra.mrb[36].mxu0 %v775_v22  ;;  %v749_v24 = vmax.f32 %v683_v23, 0.0 }
 0x1b9   : > { %v689_v54 = vadd.f32 %v688_v26, %v2014_v35  ;;  %v750_v62 = vmax.f32 %v685_v37, 0.0 }
 0x1ba   : > { %v751_v31 = vmax.f32 %v687_v53, 0.0 }
 0x1bb   : > { %v752_v38 = vmax.f32 %v689_v54, 0.0 }
 0x1bc   : > { %v777_v1 = vpack.c.bf16 %v751_v31, %v749_v24 }
 0x1bd   : > { %v692_v63 = vpop.f32.mrb[12].mxu0  ;;  %v778_v61 = vpack.c.bf16 %v752_v38, %v750_v62 }
 0x1be   : > { %v693_v25 = vadd.f32 %v692_v63, %v2010_v51  ;;  %v694_v57 = vpop.f32.mrb[13].mxu0 }
 0x1bf   : > { %v695_v55 = vadd.f32 %v694_v57, %v2014_v35  ;;  %v696_v56 = vpop.f32.mrb[14].mxu0  ;;  %1045 = vmatprep.mubr.bf16.mxu1 %v778_v61 }
 0x1c0   : > { %v697_v3 = vadd.f32 %v696_v56, %v2010_v51  ;;  %v698_v9 = vpop.f32.mrb[15].mxu0  ;;  %1046 = vmatmul.mubr.bf16.vlgmr.msra.gmra.mrb[0].mxu1 %v777_v1  ;;  %v753_v4 = vmax.f32 %v693_v25, 0.0 }
 0x1c1   : > { %v699_v8 = vadd.f32 %v698_v9, %v2014_v35  ;;  %v754_v27 = vmax.f32 %v695_v55, 0.0 }
 0x1c2   : > { %v755_v58 = vmax.f32 %v697_v3, 0.0 }
 0x1c3   : > { %v756_v30 = vmax.f32 %v699_v8, 0.0 }
 0x1c4   : > { %v779_v52 = vpack.c.bf16 %v755_v58, %v753_v4 }
 0x1c5   : > { %v780_v41 = vpack.c.bf16 %v756_v30, %v754_v27  ;;  %v702_v32 = vpop.f32.mrb[16].mxu0  ;;  %v821_v30 = vld [vmem:[%s2201_s5] sm:$0x3] }
 0x1c6   : > { %v703_v50 = vadd.f32 %v702_v32, %v2010_v51  ;;  %v704_v34 = vpop.f32.mrb[17].mxu0 }
 0x1c7   : > { %v705_v7 = vadd.f32 %v704_v34, %v2014_v35  ;;  %v706_v40 = vpop.f32.mrb[18].mxu0  ;;  %1055 = vmatprep.mubr.bf16.mxu1 %v780_v41 }
 0x1c8   : > { %v707_v10 = vadd.f32 %v706_v40, %v2010_v51  ;;  %v708_v33 = vpop.f32.mrb[19].mxu0  ;;  %1056 = vmatmul.mubr.bf16.gmra.mrb[4].mxu1 %v779_v52  ;;  %v757_v12 = vmax.f32 %v703_v50, 0.0 }
 0x1c9   : > { %v709_v17 = vadd.f32 %v708_v33, %v2014_v35  ;;  %v758_v43 = vmax.f32 %v705_v7, 0.0 }
 0x1ca   : > { %v759_v11 = vmax.f32 %v707_v10, 0.0 }
 0x1cb   : > { %v760_v42 = vmax.f32 %v709_v17, 0.0 }
 0x1cc   : > { %v781_v45 = vpack.c.bf16 %v759_v11, %v757_v12 }
 0x1cd   : > { %v782_v47 = vpack.c.bf16 %v760_v42, %v758_v43  ;;  %v712_v2 = vpop.f32.mrb[20].mxu0 }
 0x1ce   : > { %v713_v44 = vadd.f32 %v712_v2, %v2010_v51  ;;  %v714_v13 = vpop.f32.mrb[21].mxu0 }
 0x1cf   : > { %v715_v14 = vadd.f32 %v714_v13, %v2014_v35  ;;  %v716_v39 = vpop.f32.mrb[22].mxu0  ;;  %1065 = vmatprep.mubr.bf16.mxu1 %v782_v47 }
 0x1d0   : > { %v717_v15 = vadd.f32 %v716_v39, %v2010_v51  ;;  %v718_v36 = vpop.f32.mrb[23].mxu0  ;;  %1066 = vmatmul.mubr.bf16.gmra.mrb[8].mxu1 %v781_v45  ;;  %v761_v19 = vmax.f32 %v713_v44, 0.0 }
 0x1d1   : > { %v719_v18 = vadd.f32 %v718_v36, %v2014_v35  ;;  %v762_v48 = vmax.f32 %v715_v14, 0.0 }
 0x1d2   : > { %v763_v16 = vmax.f32 %v717_v15, 0.0 }
 0x1d3   : > { %v764_v60 = vmax.f32 %v719_v18, 0.0 }
 0x1d4   : > { %v783_v0 = vpack.c.bf16 %v763_v16, %v761_v19 }
 0x1d5   : > { %v784_v20 = vpack.c.bf16 %v764_v60, %v762_v48  ;;  %v722_v21 = vpop.f32.mrb[24].mxu0 }
 0x1d6   : > { %v723_v22 = vadd.f32 %v722_v21, %v2010_v51  ;;  %v724_v29 = vpop.f32.mrb[25].mxu0 }
 0x1d7   : > { %v725_v28 = vadd.f32 %v724_v29, %v2014_v35  ;;  %v726_v23 = vpop.f32.mrb[26].mxu0  ;;  %1075 = vmatprep.mubr.bf16.mxu1 %v784_v20 }
 0x1d8   : > { %v727_v46 = vadd.f32 %v726_v23, %v2010_v51  ;;  %v728_v37 = vpop.f32.mrb[27].mxu0  ;;  %1076 = vmatmul.mubr.bf16.gmra.mrb[12].mxu1 %v783_v0  ;;  %v765_v53 = vmax.f32 %v723_v22, 0.0 }
 0x1d9   : > { %v729_v49 = vadd.f32 %v728_v37, %v2014_v35  ;;  %v766_v54 = vmax.f32 %v725_v28, 0.0 }
 0x1da   : > { %v767_v26 = vmax.f32 %v727_v46, 0.0 }
 0x1db   : > { %v768_v24 = vmax.f32 %v729_v49, 0.0 }
 0x1dc   : > { %v785_v31 = vpack.c.bf16 %v767_v26, %v765_v53 }
 0x1dd   : > { %v786_v62 = vpack.c.bf16 %v768_v24, %v766_v54  ;;  %v732_v38 = vpop.f32.mrb[28].mxu0 }
 0x1de   : > { %v733_v1 = vadd.f32 %v732_v38, %v2010_v51  ;;  %v734_v63 = vpop.f32.mrb[29].mxu0 }
 0x1df   : > { %v735_v61 = vadd.f32 %v734_v63, %v2014_v35  ;;  %v736_v25 = vpop.f32.mrb[30].mxu0  ;;  %1085 = vmatprep.mubr.bf16.mxu1 %v786_v62 }
 0x1e0   : > { %v737_v57 = vadd.f32 %v736_v25, %v2010_v51  ;;  %v738_v55 = vpop.f32.mrb[31].mxu0  ;;  %1086 = vmatmul.mubr.bf16.gmra.mrb[16].mxu1 %v785_v31  ;;  %v769_v3 = vmax.f32 %v733_v1, 0.0  ;;  %v2056_v51 = vrot.slane %v821_v30, %v536_v6 }
 0x1e1   : > { %v739_v56 = vadd.f32 %v738_v55, %v2014_v35  ;;  %v770_v8 = vmax.f32 %v735_v61, 0.0  ;;  %v2060_v35 = vrot.slane %v821_v30, %v540_v5 }
 0x1e2   : > { %v771_v9 = vmax.f32 %v737_v57, 0.0 }
 0x1e3   : > { %v772_v4 = vmax.f32 %v739_v56, 0.0 }
 0x1e4   : > { %v787_v58 = vpack.c.bf16 %v771_v9, %v769_v3 }
 0x1e5   : > { %v788_v27 = vpack.c.bf16 %v772_v4, %v770_v8 }
 0x1e7   : > { %1095 = vmatprep.mubr.bf16.mxu1 %v788_v27 }
 0x1e8   : > { %1096 = vmatmul.mubr.bf16.gmra.mrb[20].mxu1 %v787_v58 }
 0x283   : > { %v1027_v52 = vpop.f32.mrb[32].mxu0 }
 0x284   : > { %v1028_v41 = vadd.f32 %v1027_v52, %v2056_v51  ;;  %v1029_v32 = vpop.f32.mrb[33].mxu0 }
 0x285   : > { %v1030_v50 = vadd.f32 %v1029_v32, %v2060_v35  ;;  %v1031_v34 = vpop.f32.mrb[34].mxu0 }
 0x286   : > { %1106 = vst [vmem:[%s2064_s20] sm:$0xff] %v1028_v41  ;;  %v1032_v59 = vadd.f32 %v1031_v34, %v2056_v51  ;;  %v1033_v6 = vpop.f32.mrb[35].mxu0 }
 0x287   : > { %1108 = vst.msk [vmem:[%s2064_s20 + $0x8] sm:$0xff] %vm1107_vm1, %v1030_v50  ;;  %v1034_v5 = vadd.f32 %v1033_v6, %v2060_v35 }
 0x288   : > { %1109 = vst [vmem:[%s2064_s20 + $0x10] sm:$0xff] %v1032_v59 }
 0x289   : > { %1110 = vst.msk [vmem:[%s2064_s20 + $0x18] sm:$0xff] %vm1107_vm1, %v1034_v5 }
 0x28b   : > { %v1037_v7 = vpop.f32.mrb[36].mxu0 }
 0x28c   : > { %v1038_v40 = vadd.f32 %v1037_v7, %v2056_v51  ;;  %v1039_v10 = vpop.f32.mrb[37].mxu0 }
 0x28d   : > { %v1040_v33 = vadd.f32 %v1039_v10, %v2060_v35  ;;  %v1041_v17 = vpop.f32.mrb[38].mxu0 }
 0x28e   : > { %1111 = vst [vmem:[%s2064_s20 + $0x20] sm:$0xff] %v1038_v40  ;;  %v1042_v12 = vadd.f32 %v1041_v17, %v2056_v51  ;;  %v1043_v11 = vpop.f32.mrb[39].mxu0 }
 0x28f   : > { %1112 = vst.msk [vmem:[%s2064_s20 + $0x28] sm:$0xff] %vm1107_vm1, %v1040_v33  ;;  %v1044_v43 = vadd.f32 %v1043_v11, %v2060_v35 }
 0x290   : > { %1113 = vst [vmem:[%s2064_s20 + $0x30] sm:$0xff] %v1042_v12 }
 0x291   : > { %1114 = vst.msk [vmem:[%s2064_s20 + $0x38] sm:$0xff] %vm1107_vm1, %v1044_v43 }
 0x293   : > { %v1047_v42 = vpop.f32.mrb[0].mxu1 }
 0x294   : > { %v1048_v45 = vadd.f32 %v1047_v42, %v2056_v51  ;;  %v1049_v47 = vpop.f32.mrb[1].mxu1 }
 0x295   : > { %v1050_v2 = vadd.f32 %v1049_v47, %v2060_v35  ;;  %v1051_v44 = vpop.f32.mrb[2].mxu1 }
 0x296   : > { %1115 = vst [vmem:[%s2064_s20 + $0x40] sm:$0xff] %v1048_v45  ;;  %v1052_v13 = vadd.f32 %v1051_v44, %v2056_v51  ;;  %v1053_v14 = vpop.f32.mrb[3].mxu1 }
 0x297   : > { %1116 = vst.msk [vmem:[%s2064_s20 + $0x48] sm:$0xff] %vm1107_vm1, %v1050_v2  ;;  %v1054_v39 = vadd.f32 %v1053_v14, %v2060_v35 }
 0x298   : > { %1117 = vst [vmem:[%s2064_s20 + $0x50] sm:$0xff] %v1052_v13 }
 0x299   : > { %1118 = vst.msk [vmem:[%s2064_s20 + $0x58] sm:$0xff] %vm1107_vm1, %v1054_v39 }
 0x29b   : > { %v1057_v15 = vpop.f32.mrb[4].mxu1 }
 0x29c   : > { %v1058_v36 = vadd.f32 %v1057_v15, %v2056_v51  ;;  %v1059_v18 = vpop.f32.mrb[5].mxu1 }
 0x29d   : > { %v1060_v19 = vadd.f32 %v1059_v18, %v2060_v35  ;;  %v1061_v16 = vpop.f32.mrb[6].mxu1 }
 0x29e   : > { %1119 = vst [vmem:[%s2064_s20 + $0x60] sm:$0xff] %v1058_v36  ;;  %v1062_v48 = vadd.f32 %v1061_v16, %v2056_v51  ;;  %v1063_v60 = vpop.f32.mrb[7].mxu1 }
 0x29f   : > { %1120 = vst.msk [vmem:[%s2064_s20 + $0x68] sm:$0xff] %vm1107_vm1, %v1060_v19  ;;  %v1064_v0 = vadd.f32 %v1063_v60, %v2060_v35 }
 0x2a0   : > { %1121 = vst [vmem:[%s2064_s20 + $0x70] sm:$0xff] %v1062_v48 }
 0x2a1   : > { %1122 = vst.msk [vmem:[%s2064_s20 + $0x78] sm:$0xff] %vm1107_vm1, %v1064_v0 }
 0x2a3   : > { %v1067_v20 = vpop.f32.mrb[8].mxu1 }
 0x2a4   : > { %v1068_v21 = vadd.f32 %v1067_v20, %v2056_v51  ;;  %v1069_v22 = vpop.f32.mrb[9].mxu1 }
 0x2a5   : > { %v1070_v29 = vadd.f32 %v1069_v22, %v2060_v35  ;;  %v1071_v28 = vpop.f32.mrb[10].mxu1 }
 0x2a6   : > { %1123 = vst [vmem:[%s2064_s20 + $0x80] sm:$0xff] %v1068_v21  ;;  %v1072_v23 = vadd.f32 %v1071_v28, %v2056_v51  ;;  %v1073_v46 = vpop.f32.mrb[11].mxu1 }
 0x2a7   : > { %1124 = vst.msk [vmem:[%s2064_s20 + $0x88] sm:$0xff] %vm1107_vm1, %v1070_v29  ;;  %v1074_v37 = vadd.f32 %v1073_v46, %v2060_v35 }
 0x2a8   : > { %1125 = vst [vmem:[%s2064_s20 + $0x90] sm:$0xff] %v1072_v23 }
 0x2a9   : > { %1126 = vst.msk [vmem:[%s2064_s20 + $0x98] sm:$0xff] %vm1107_vm1, %v1074_v37 }
 0x2ab   : > { %v1077_v49 = vpop.f32.mrb[12].mxu1 }
 0x2ac   : > { %v1078_v53 = vadd.f32 %v1077_v49, %v2056_v51  ;;  %v1079_v26 = vpop.f32.mrb[13].mxu1 }
 0x2ad   : > { %v1080_v54 = vadd.f32 %v1079_v26, %v2060_v35  ;;  %v1081_v24 = vpop.f32.mrb[14].mxu1 }
 0x2ae   : > { %1127 = vst [vmem:[%s2064_s20 + $0xa0] sm:$0xff] %v1078_v53  ;;  %v1082_v31 = vadd.f32 %v1081_v24, %v2056_v51  ;;  %v1083_v62 = vpop.f32.mrb[15].mxu1 }
 0x2af   : > { %1128 = vst.msk [vmem:[%s2064_s20 + $0xa8] sm:$0xff] %vm1107_vm1, %v1080_v54  ;;  %v1084_v38 = vadd.f32 %v1083_v62, %v2060_v35 }
 0x2b0   : > { %1129 = vst [vmem:[%s2064_s20 + $0xb0] sm:$0xff] %v1082_v31 }
 0x2b1   : > { %1130 = vst.msk [vmem:[%s2064_s20 + $0xb8] sm:$0xff] %vm1107_vm1, %v1084_v38 }
 0x2b3   : > { %v1087_v1 = vpop.f32.mrb[16].mxu1 }
 0x2b4   : > { %v1088_v63 = vadd.f32 %v1087_v1, %v2056_v51  ;;  %v1089_v61 = vpop.f32.mrb[17].mxu1 }
 0x2b5   : > { %v1090_v25 = vadd.f32 %v1089_v61, %v2060_v35  ;;  %v1091_v57 = vpop.f32.mrb[18].mxu1 }
 0x2b6   : > { %1131 = vst [vmem:[%s2064_s20 + $0xc0] sm:$0xff] %v1088_v63  ;;  %v1092_v55 = vadd.f32 %v1091_v57, %v2056_v51  ;;  %v1093_v56 = vpop.f32.mrb[19].mxu1 }
 0x2b7   : > { %1132 = vst.msk [vmem:[%s2064_s20 + $0xc8] sm:$0xff] %vm1107_vm1, %v1090_v25  ;;  %v1094_v3 = vadd.f32 %v1093_v56, %v2060_v35 }
 0x2b8   : > { %1133 = vst [vmem:[%s2064_s20 + $0xd0] sm:$0xff] %v1092_v55 }
 0x2b9   : > { %1134 = vst.msk [vmem:[%s2064_s20 + $0xd8] sm:$0xff] %vm1107_vm1, %v1094_v3 }
 0x2bb   : > { %v1097_v9 = vpop.f32.mrb[20].mxu1 }
 0x2bc   : > { %v1098_v8 = vadd.f32 %v1097_v9, %v2056_v51  ;;  %v1099_v4 = vpop.f32.mrb[21].mxu1 }
 0x2bd   : > { %v1100_v58 = vadd.f32 %v1099_v4, %v2060_v35  ;;  %v1101_v27 = vpop.f32.mrb[22].mxu1 }
 0x2be   : > { %1135 = vst [vmem:[%s2064_s20 + $0xe0] sm:$0xff] %v1098_v8  ;;  %v1102_v30 = vadd.f32 %v1101_v27, %v2056_v51  ;;  %v1103_v52 = vpop.f32.mrb[23].mxu1 }
 0x2bf   : > { %1136 = vst.msk [vmem:[%s2064_s20 + $0xe8] sm:$0xff] %vm1107_vm1, %v1100_v58  ;;  %v1104_v41 = vadd.f32 %v1103_v52, %v2060_v35 }
 0x2c0   : > { %1137 = vst [vmem:[%s2064_s20 + $0xf0] sm:$0xff] %v1102_v30 }
 0x2c1   : > { %1138 = vst.msk [vmem:[%s2064_s20 + $0xf8] sm:$0xff] %vm1107_vm1, %v1104_v41 }
 0x2c2   : > { %1468 = shalt.err (!%p1465_p3)
}
 0x2c3   : > { %s1469_s15 = scalar_lea.hbm %s2143_s10, 4096  ;;  %s1473_s18 = scalar_lea.hbm %s2202_s6, 8192 }
 0x2c4   : > { %p1470_p4 = scmp.ne.s32.totalorder %s2143_s10, %s1469_s15  ;;  %p1474_p9 = scmp.lt.u32.totalorder %s2143_s10, %s2202_s6 }
 0x2c5   : > { %p1475_p10 = scmp.lt.u32.totalorder %s1473_s18, %s1469_s15  ;;  %p1477_p12 = scmp.lt.u32.totalorder %s1469_s15, %s2143_s10 }
 0x2c6   : > { %p1471_p7 = pnand %p1470_p4, %p1596_p5 }
 0x2c7   : > { %p1476_p11 = por %p1475_p10, %p1474_p9 }
 0x2c8   : > { %p1472_p8 = pneg %p1471_p7 }
 0x2c9   : > { %p1478_p13 = por %p1477_p12, %p1476_p11 }
 0x2cb   : > { %p1479_p0 = pnand %p1478_p13, %p1472_p8 }
 0x2cd   : > { %1482 = shalt.err (!%p1479_p0)
}
 0x2ce   : > { %s1521_s26 = smov 256   ;;  %s1522_s29 = smov 16  }
 0x2cf   : > { %1315 = dma.vmem_to_hbm [thread:$0]  (%p1596_p5), %s2145_s28, 4096, %s2143_s10, %s2155_s25, %s1521_s26, %s1521_s26, %s1522_s29  }
 0x2d0 PF: > { %p1321_p1 = scmp.ge.s32.totalorder %s1517_s24, 2  ;;  %s1169_s9 = sand.u32 1, %s1505_s21  }
 0x2d1   : > { %s1170_s11 = scalar_lea.sflag [#allocation3], %s1169_s9 }
 0x2d2   : > { %p1318_p2 = pnand %p1321_p1, %p1600_p6 }
 0x2d4   : > { %1500 = dma.done.wait (!%p1318_p2), %s1170_s11, 4096  }
 0x2d5   : > { %1502 = vsyncadd (!%p1318_p2), %s1170_s11, 4294963200  ;;  %p16_p3 = scmp.ge.s32.totalorder %s1583_s27, 4   ;;  %s2244_s21 = smov %s1509_s22 }
 0x2d6   : > { %s2245_s22 = smov %s1513_s23  ;;  %s2246_s23 = smov %s1594_s30 }
 0x2d7   : > { %s2247_s24 = smov %s1583_s27  ;;  %18 = sbr.rel (!%p16_p3) target bundleno = 3 (0x3), region = 79 }
 0x2de   :  { %1175 = vsyncpa [#allocation3], 1 }
 0x2df   :  { %1177 = vsyncpa [#allocation3 + $0x1], 1 }

</bundles_post_ra>
